<compile_context>
chip_gen: v5e
topology: v5e:2x2
jax: 0.10.0
libtpu: 0.0.40
codegen_flags: <defaults>
</compile_context>

<pallas_src>
import jax
import jax.numpy as jnp
from jax.experimental import pallas as pl
from jax.experimental.pallas import tpu as pltpu


def _multi_mlp_fused_kernel(x_ref, w1_ref, b1_ref, w2_ref, b2_ref, out_ref):
    # x_ref  : (B, D_in)     f32   shared input
    # w1_ref : (D_in, K*H)   bf16  fused first-layer weights (all K models)
    # b1_ref : (1, K*H)      f32
    # w2_ref : (K, H, Cp)    bf16  second-layer weights, class dim padded to Cp
    # b2_ref : (1, K*Cp)     f32
    # out_ref: (B, K*Cp)     f32   lane-dense (Cp = multiple of 128)
    K, H, Cp = w2_ref.shape

    x = x_ref[...].astype(jnp.bfloat16)
    # One wide MXU matmul for all K first layers, f32 accumulation.
    h = jnp.dot(x, w1_ref[...], preferred_element_type=jnp.float32)
    h = jnp.maximum(h + b1_ref[...], 0.0).astype(jnp.bfloat16)      # (B, K*H)

    # Second layer: per-model matmul on the resident, 128-lane-aligned hidden
    # slice (K is tiny and static -> unrolled), then a single concatenated
    # lane-dense store instead of K separate writes.
    logits = [
        jnp.dot(h[:, k * H:(k + 1) * H], w2_ref[k],
                preferred_element_type=jnp.float32)                 # (B, Cp)
        for k in range(K)
    ]
    out_ref[...] = jnp.concatenate(logits, axis=-1) + b2_ref[...]   # (B, K*Cp)


def make_multi_model_forward(w1, b1, w2, b2):
    """Prepares fused bf16 parameters ONCE and returns a jitted forward.

    The returned callable maps x (B, C, H, W) -> tuple of K (B, num_classes)
    logits, mirroring MultiModel.forward's list of per-model outputs, with all
    glue (flatten, kernel call, per-model slicing) fused in a single jit.
    """
    K, D_in, H = w1.shape
    C = w2.shape[-1]
    Cp = ((C + 127) // 128) * 128            # lane-dense padded class dim

    # ---- one-time parameter re-layout (eager, runs exactly once) ----------
    # Fused layer-1 weights: column block k holds model k's W1 (col = k*H + h).
    w1_all = jnp.transpose(w1, (1, 0, 2)).reshape(D_in, K * H).astype(jnp.bfloat16)
    b1_all = b1.reshape(1, K * H).astype(jnp.float32)
    # Layer-2 weights / biases, class dim padded to Cp lanes.
    w2_p = jnp.pad(w2, ((0, 0), (0, 0), (0, Cp - C))).astype(jnp.bfloat16)
    b2_all = jnp.pad(b2, ((0, 0), (0, Cp - C))).reshape(1, K * Cp).astype(jnp.float32)
    w1_all, b1_all, w2_p, b2_all = jax.device_put((w1_all, b1_all, w2_p, b2_all))

    vmem = pltpu.MemorySpace.VMEM

    def _forward(x_nchw):
        B = x_nchw.shape[0]
        x_flat = x_nchw.reshape(B, -1).astype(jnp.float32)          # (B, D_in)
        out = pl.pallas_call(
            _multi_mlp_fused_kernel,
            out_shape=jax.ShapeDtypeStruct((B, K * Cp), jnp.float32),
            # Grid-less call: single invocation, operands resident in VMEM,
            # no pipeline double-buffering (~880 KB total fits easily).
            in_specs=[
                pl.BlockSpec(memory_space=vmem),   # x
                pl.BlockSpec(memory_space=vmem),   # fused W1
                pl.BlockSpec(memory_space=vmem),   # fused b1
                pl.BlockSpec(memory_space=vmem),   # W2 (padded)
                pl.BlockSpec(memory_space=vmem),   # fused b2 (padded)
            ],
            out_specs=pl.BlockSpec(memory_space=vmem),
        )(x_flat, w1_all, b1_all, w2_p, b2_all)
        # Per-model slices happen INSIDE the same jit -> single dispatch.
        return tuple(out[:, k * Cp:k * Cp + C] for k in range(K))

    return jax.jit(_forward)


if __name__ == "__main__":
    # Small shapes consistent with the module: one NCHW image input, K=3
    # sub-models, each a 2-layer MLP over the flattened image.
    B, Cin, Himg, Wimg = 2, 4, 16, 16
    D_in = Cin * Himg * Wimg       # 1024
    HID = 128
    NUM_CLASSES = 10
    K = 3

    key = jax.random.PRNGKey(0)
    kx, k1, k2, k3, k4 = jax.random.split(key, 5)

    x = jax.random.normal(kx, (B, Cin, Himg, Wimg), dtype=jnp.float32)
    w1 = jax.random.normal(k1, (K, D_in, HID), dtype=jnp.float32) * (1.0 / jnp.sqrt(D_in))
    b1 = jax.random.normal(k2, (K, HID), dtype=jnp.float32) * 0.01
    w2 = jax.random.normal(k3, (K, HID, NUM_CLASSES), dtype=jnp.float32) * (1.0 / jnp.sqrt(HID))
    b2 = jax.random.normal(k4, (K, NUM_CLASSES), dtype=jnp.float32) * 0.01

    forward = make_multi_model_forward(w1, b1, w2, b2)   # params prepared once
    outputs = list(forward(x))                           # one fused dispatch
    outputs = [jax.block_until_ready(o) for o in outputs]

    # Reference in plain JAX, mirroring the kernel's bf16 weight/activation
    # rounding (f32 accumulation) so the tolerance can stay tight.
    x_flat = x.reshape(B, D_in)
    xb = x_flat.astype(jnp.bfloat16).astype(jnp.float32)
    for k in range(K):
        w1b = w1[k].astype(jnp.bfloat16).astype(jnp.float32)
        w2b = w2[k].astype(jnp.bfloat16).astype(jnp.float32)
        hid = jnp.maximum(xb @ w1b + b1[k], 0.0)
        hid = hid.astype(jnp.bfloat16).astype(jnp.float32)
        ref = hid @ w2b + b2[k]
        assert outputs[k].shape == (B, NUM_CLASSES)
        err = jnp.max(jnp.abs(outputs[k] - ref))
        assert jnp.allclose(outputs[k], ref, atol=1e-2, rtol=1e-2), (
            f"model {k}: max abs err {err:.3e}")

    print("KERNEL_OK")
</pallas_src>

<mosaic_0001>
module attributes {stable_mosaic.version = 11 : i64} {
  func.func @_multi_mlp_fused_kernel(%arg0: memref<2x1024xf32, #tpu.memory_space<vmem>>, %arg1: memref<1024x384xbf16, #tpu.memory_space<vmem>>, %arg2: memref<1x384xf32, #tpu.memory_space<vmem>>, %arg3: memref<3x128x128xbf16, #tpu.memory_space<vmem>>, %arg4: memref<1x384xf32, #tpu.memory_space<vmem>>, %arg5: memref<2x384xf32, #tpu.memory_space<vmem>>) attributes {dimension_semantics = [], scalar_prefetch = 0 : i64, scratch_operands = 0 : i64, tpu.core_type = #tpu.core_type<tc>} {
    %c0 = arith.constant 0 : index
    %c0_0 = arith.constant 0 : index
    %0 = vector.load %arg0[%c0, %c0_0] : memref<2x1024xf32, #tpu.memory_space<vmem>>, vector<2x1024xf32>
    %1 = arith.truncf %0 : vector<2x1024xf32> to vector<2x1024xbf16>
    %c0_1 = arith.constant 0 : index
    %c0_2 = arith.constant 0 : index
    %2 = vector.load %arg1[%c0_1, %c0_2] : memref<1024x384xbf16, #tpu.memory_space<vmem>>, vector<1024x384xbf16>
    %cst = arith.constant dense<0.000000e+00> : vector<2x384xf32>
    %3 = tpu.matmul %1, %2, %cst {dimension_numbers = #tpu.dot_dimension_numbers<[1], [0], [0], [1], [0, 0, 1, 1], [], []>} : vector<2x1024xbf16>, vector<1024x384xbf16>, vector<2x384xf32> -> vector<2x384xf32>
    %c0_3 = arith.constant 0 : index
    %c0_4 = arith.constant 0 : index
    %4 = vector.load %arg2[%c0_3, %c0_4] : memref<1x384xf32, #tpu.memory_space<vmem>>, vector<1x384xf32>
    %5 = vector.broadcast %4 : vector<1x384xf32> to vector<2x384xf32>
    %6 = arith.addf %3, %5 : vector<2x384xf32>
    %cst_5 = arith.constant 0.000000e+00 : f32
    %7 = vector.broadcast %cst_5 : f32 to vector<2x384xf32>
    %8 = arith.maximumf %6, %7 : vector<2x384xf32>
    %9 = arith.truncf %8 : vector<2x384xf32> to vector<2x384xbf16>
    %10 = vector.extract_strided_slice %9 {offsets = [0, 0], sizes = [2, 128], strides = [1, 1]} : vector<2x384xbf16> to vector<2x128xbf16>
    %c0_6 = arith.constant 0 : index
    %c0_7 = arith.constant 0 : index
    %c0_8 = arith.constant 0 : index
    %11 = vector.load %arg3[%c0_6, %c0_7, %c0_8] : memref<3x128x128xbf16, #tpu.memory_space<vmem>>, vector<1x128x128xbf16>
    %12 = vector.shape_cast %11 : vector<1x128x128xbf16> to vector<128x128xbf16>
    %cst_9 = arith.constant dense<0.000000e+00> : vector<2x128xf32>
    %13 = tpu.matmul %10, %12, %cst_9 {dimension_numbers = #tpu.dot_dimension_numbers<[1], [0], [0], [1], [0, 0, 1, 1], [], []>} : vector<2x128xbf16>, vector<128x128xbf16>, vector<2x128xf32> -> vector<2x128xf32>
    %14 = vector.extract_strided_slice %9 {offsets = [0, 128], sizes = [2, 128], strides = [1, 1]} : vector<2x384xbf16> to vector<2x128xbf16>
    %c1 = arith.constant 1 : index
    %c0_10 = arith.constant 0 : index
    %c0_11 = arith.constant 0 : index
    %15 = vector.load %arg3[%c1, %c0_10, %c0_11] : memref<3x128x128xbf16, #tpu.memory_space<vmem>>, vector<1x128x128xbf16>
    %16 = vector.shape_cast %15 : vector<1x128x128xbf16> to vector<128x128xbf16>
    %cst_12 = arith.constant dense<0.000000e+00> : vector<2x128xf32>
    %17 = tpu.matmul %14, %16, %cst_12 {dimension_numbers = #tpu.dot_dimension_numbers<[1], [0], [0], [1], [0, 0, 1, 1], [], []>} : vector<2x128xbf16>, vector<128x128xbf16>, vector<2x128xf32> -> vector<2x128xf32>
    %18 = vector.extract_strided_slice %9 {offsets = [0, 256], sizes = [2, 128], strides = [1, 1]} : vector<2x384xbf16> to vector<2x128xbf16>
    %c2 = arith.constant 2 : index
    %c0_13 = arith.constant 0 : index
    %c0_14 = arith.constant 0 : index
    %19 = vector.load %arg3[%c2, %c0_13, %c0_14] : memref<3x128x128xbf16, #tpu.memory_space<vmem>>, vector<1x128x128xbf16>
    %20 = vector.shape_cast %19 : vector<1x128x128xbf16> to vector<128x128xbf16>
    %cst_15 = arith.constant dense<0.000000e+00> : vector<2x128xf32>
    %21 = tpu.matmul %18, %20, %cst_15 {dimension_numbers = #tpu.dot_dimension_numbers<[1], [0], [0], [1], [0, 0, 1, 1], [], []>} : vector<2x128xbf16>, vector<128x128xbf16>, vector<2x128xf32> -> vector<2x128xf32>
    %22 = tpu.concatenate %13, %17, %21 in 1 : vector<2x128xf32>, vector<2x128xf32>, vector<2x128xf32> -> vector<2x384xf32>
    %c0_16 = arith.constant 0 : index
    %c0_17 = arith.constant 0 : index
    %23 = vector.load %arg4[%c0_16, %c0_17] : memref<1x384xf32, #tpu.memory_space<vmem>>, vector<1x384xf32>
    %24 = vector.broadcast %23 : vector<1x384xf32> to vector<2x384xf32>
    %25 = arith.addf %22, %24 : vector<2x384xf32>
    %c0_18 = arith.constant 0 : index
    %c0_19 = arith.constant 0 : index
    %26 = vector.load %arg5[%c0_18, %c0_19] : memref<2x384xf32, #tpu.memory_space<vmem>>, vector<2x384xf32>
    tpu.vector_store %arg5[%c0_18, %c0_19], %25 {strides = array<i32>} : memref<2x384xf32, #tpu.memory_space<vmem>>, vector<2x384xf32>,
    return
  }
}

</mosaic_0001>

<bundles_post_ra>
// kernel: _forward.1
= control target key start
LH: loop header
LB: loop body
LE: loop exit
PB: predicated region body
PF: predicated region fallthrough
CT: control target
= control target key end

     0   :  { %10 = vsyncpa [#allocation3], 0  ;;  %s3193_s0 = inlined_call_operand.vmem [shape: f32[2,1024], index: 0, kind: input, shape index: {}]   ;;  %s3194_s1 = inlined_call_operand.hbm [shape: bf16[1024,384], index: 1, kind: input, shape index: {}]   ;;  %s3195_s2 = inlined_call_operand.vmem [shape: f32[1,384], index: 2, kind: input, shape index: {}]   ;;  %s3196_s3 = inlined_call_operand.hbm [shape: bf16[3,128,128], index: 3, kind: input, shape index: {}]   ;;  %s3197_s4 = inlined_call_operand.vmem [shape: f32[1,384], index: 4, kind: input, shape index: {}]   ;;  %s3198_s5 = inlined_call_operand.vmem [shape: f32[2,384], index: 5, kind: output, shape index: {}]  }
   0x1   :  { %s18_s20 = sshll.u32 %s3194_s1, 4  ;;  %s19_s20 = int_to_ptr.hbm [resolvable:$true] %s18_s20 }
   0x2   :  { %11 = vsyncpa [#allocation5], 0  ;;  %s3091_s21 = smov [#allocation2]   ;;  %s33_s25 = sshll.u32 %s3196_s3, 4  ;;  %s34_s25 = int_to_ptr.hbm [resolvable:$true] %s33_s25 }
   0x3   :  { %s20_s22 = sshll.u32 %s3091_s21, 4  ;;  %s3092_s26 = smov 192   ;;  %s21_s22 = int_to_ptr.vmem [resolvable:$true] %s20_s22 }
   0x4   :  { %s3093_s27 = smov 12   ;;  %s3094_s28 = smov [#allocation4]  }
   0x5   :  { %26 = dma.hbm_to_vmem [thread:$0]  %s19_s20, 24576, %s21_s22, [#allocation3], %s3092_s26, %s3092_s26, %s3093_s27  }
   0x6   :  { %s35_s29 = sshll.u32 %s3094_s28, 4  ;;  %s3095_s30 = smov 64   ;;  %s36_s29 = int_to_ptr.vmem [resolvable:$true] %s35_s29 }
   0x7   :  { %s3096_s6 = smov 4  }
   0x8   :  { %41 = dma.hbm_to_vmem [thread:$0]  %s34_s25, 3072, %s36_s29, [#allocation5], %s3095_s30, %s3095_s30, %s3096_s6  }
   0x9   :  { %3087 = dma.done.wait [#allocation3], 24576  }
   0xa   :  { %3088 = vsyncadd [#allocation3], 4294942720 }
   0xb   :  { %3089 = dma.done.wait [#allocation5], 3072  }
   0xc   :  { %3090 = vsyncadd [#allocation5], 4294964224  ;;  %v2039_v0 = vld [vmem:[#allocation2 + $0xa8] sm:$0xf]  ;;  %v2839_v1 = vld [vmem:[#allocation2 + $0xb0] sm:$0xf0] }
   0xd   :  { %v2135_v2 = vld [vmem:[#allocation2 + $0x168] sm:$0xf]  ;;  %v2040_v3 = vor.u32 %v2839_v1, %v2039_v0  ;;  %v2863_v4 = vld [vmem:[#allocation2 + $0x170] sm:$0xf0]  ;;  %v2027_v11 = vld [vmem:[#allocation2 + $0x90] sm:$0xf] }
   0xe   :  { %v2231_v5 = vld [vmem:[#allocation2 + $0x228] sm:$0xf]  ;;  %v2887_v6 = vld [vmem:[#allocation2 + $0x230] sm:$0xf0]  ;;  %v2136_v7 = vor.u32 %v2863_v4, %v2135_v2  ;;  %v2836_v13 = vld [vmem:[#allocation2 + $0x98] sm:$0xf0] }
   0xf   :  { %v2232_v8 = vor.u32 %v2887_v6, %v2231_v5  ;;  %v2327_v9 = vld [vmem:[#allocation2 + $0x2e8] sm:$0xf]  ;;  %v2911_v10 = vld [vmem:[#allocation2 + $0x2f0] sm:$0xf0]  ;;  %1371 = vmatpush.bf16.msra.mxu0 %v2040_v3  ;;  %v2123_v14 = vld [vmem:[#allocation2 + $0x150] sm:$0xf]  ;;  %v2028_v16 = vor.u32 %v2836_v13, %v2027_v11 }
  0x10   :  { %v2328_v12 = vor.u32 %v2911_v10, %v2327_v9  ;;  %v2860_v15 = vld [vmem:[#allocation2 + $0x158] sm:$0xf0]  ;;  %1384 = vmatpush.bf16.msra.mxu1 %v2136_v7  ;;  %v2219_v18 = vld [vmem:[#allocation2 + $0x210] sm:$0xf]  ;;  %v2015_v23 = vld [vmem:[#allocation2 + $0x78] sm:$0xf] }
  0x11   :  { %1397 = vmatpush.bf16.msra.mxu2 %v2232_v8  ;;  %v2124_v17 = vor.u32 %v2860_v15, %v2123_v14  ;;  %v2884_v19 = vld [vmem:[#allocation2 + $0x218] sm:$0xf0]  ;;  %v2315_v20 = vld [vmem:[#allocation2 + $0x2d0] sm:$0xf]  ;;  %v2833_v24 = vld [vmem:[#allocation2 + $0x80] sm:$0xf0] }
  0x12   :  { %1410 = vmatpush.bf16.msra.mxu3 %v2328_v12  ;;  %v2220_v21 = vor.u32 %v2884_v19, %v2219_v18  ;;  %v2908_v22 = vld [vmem:[#allocation2 + $0x2d8] sm:$0xf0]  ;;  %v2111_v26 = vld [vmem:[#allocation2 + $0x138] sm:$0xf]  ;;  %v2857_v27 = vld [vmem:[#allocation2 + $0x140] sm:$0xf0]  ;;  %v2016_v29 = vor.u32 %v2833_v24, %v2015_v23 }
  0x13   :  { %v2316_v25 = vor.u32 %v2908_v22, %v2315_v20  ;;  %v2207_v28 = vld [vmem:[#allocation2 + $0x1f8] sm:$0xf]  ;;  %1372 = vmatpush.bf16.msra.mxu0 %v2028_v16  ;;  %v2881_v30 = vld [vmem:[#allocation2 + $0x200] sm:$0xf0]  ;;  %v2112_v33 = vor.u32 %v2857_v27, %v2111_v26  ;;  %v2003_v35 = vld [vmem:[#allocation2 + $0x60] sm:$0xf] }
  0x14   :  { %v2303_v31 = vld [vmem:[#allocation2 + $0x2b8] sm:$0xf]  ;;  %v2905_v32 = vld [vmem:[#allocation2 + $0x2c0] sm:$0xf0]  ;;  %1385 = vmatpush.bf16.msra.mxu1 %v2124_v17  ;;  %v2208_v34 = vor.u32 %v2881_v30, %v2207_v28  ;;  %v2830_v36 = vld [vmem:[#allocation2 + $0x68] sm:$0xf0] }
  0x15   :  { %1398 = vmatpush.bf16.msra.mxu2 %v2220_v21  ;;  %v2099_v37 = vld [vmem:[#allocation2 + $0x120] sm:$0xf]  ;;  %v2304_v38 = vor.u32 %v2905_v32, %v2303_v31  ;;  %v2854_v39 = vld [vmem:[#allocation2 + $0x128] sm:$0xf0]  ;;  %v2004_v44 = vor.u32 %v2830_v36, %v2003_v35  ;;  %v1991_v47 = vld [vmem:[#allocation2 + $0x48] sm:$0xf] }
  0x16   :  { %1411 = vmatpush.bf16.msra.mxu3 %v2316_v25  ;;  %v2195_v40 = vld [vmem:[#allocation2 + $0x1e0] sm:$0xf]  ;;  %v2878_v41 = vld [vmem:[#allocation2 + $0x1e8] sm:$0xf0]  ;;  %v2100_v45 = vor.u32 %v2854_v39, %v2099_v37  ;;  %v2827_v48 = vld [vmem:[#allocation2 + $0x50] sm:$0xf0] }
  0x17   :  { %v2291_v42 = vld [vmem:[#allocation2 + $0x2a0] sm:$0xf]  ;;  %v2902_v43 = vld [vmem:[#allocation2 + $0x2a8] sm:$0xf0]  ;;  %1373 = vmatpush.bf16.msra.mxu0 %v2016_v29  ;;  %v2196_v46 = vor.u32 %v2878_v41, %v2195_v40  ;;  %v2087_v49 = vld [vmem:[#allocation2 + $0x108] sm:$0xf]  ;;  %v1992_v56 = vor.u32 %v2827_v48, %v1991_v47 }
  0x18   :  { %1386 = vmatpush.bf16.msra.mxu1 %v2112_v33  ;;  %v2292_v50 = vor.u32 %v2902_v43, %v2291_v42  ;;  %v2851_v51 = vld [vmem:[#allocation2 + $0x110] sm:$0xf0]  ;;  %v2183_v52 = vld [vmem:[#allocation2 + $0x1c8] sm:$0xf]  ;;  %v1979_v59 = vld [vmem:[#allocation2 + $0x30] sm:$0xf] }
  0x19   :  { %1399 = vmatpush.bf16.msra.mxu2 %v2208_v34  ;;  %v2875_v53 = vld [vmem:[#allocation2 + $0x1d0] sm:$0xf0]  ;;  %v2279_v54 = vld [vmem:[#allocation2 + $0x288] sm:$0xf]  ;;  %v2088_v57 = vor.u32 %v2851_v51, %v2087_v49  ;;  %v2824_v60 = vld [vmem:[#allocation2 + $0x38] sm:$0xf0] }
  0x1a   :  { %1412 = vmatpush.bf16.msra.mxu3 %v2304_v38  ;;  %v2899_v55 = vld [vmem:[#allocation2 + $0x290] sm:$0xf0]  ;;  %v2184_v58 = vor.u32 %v2875_v53, %v2183_v52  ;;  %v2075_v61 = vld [vmem:[#allocation2 + $0xf0] sm:$0xf]  ;;  %v2848_v63 = vld [vmem:[#allocation2 + $0xf8] sm:$0xf0]  ;;  %v1980_v4 = vor.u32 %v2824_v60, %v1979_v59 }
  0x1b   :  { %1374 = vmatpush.bf16.msra.mxu0 %v2004_v44  ;;  %v2280_v62 = vor.u32 %v2899_v55, %v2279_v54  ;;  %v2171_v0 = vld [vmem:[#allocation2 + $0x1b0] sm:$0xf]  ;;  %v2872_v1 = vld [vmem:[#allocation2 + $0x1b8] sm:$0xf0]  ;;  %v2076_v5 = vor.u32 %v2848_v63, %v2075_v61  ;;  %v1967_v7 = vld [vmem:[#allocation2 + $0x18] sm:$0xf] }
  0x1c   :  { %1387 = vmatpush.bf16.msra.mxu1 %v2100_v45  ;;  %v2267_v2 = vld [vmem:[#allocation2 + $0x270] sm:$0xf]  ;;  %v2896_v3 = vld [vmem:[#allocation2 + $0x278] sm:$0xf0]  ;;  %v2172_v6 = vor.u32 %v2872_v1, %v2171_v0  ;;  %v2821_v8 = vld [vmem:[#allocation2 + $0x20] sm:$0xf0] }
  0x1d   :  { %1400 = vmatpush.bf16.msra.mxu2 %v2196_v46  ;;  %v2063_v9 = vld [vmem:[#allocation2 + $0xd8] sm:$0xf]  ;;  %v2268_v10 = vor.u32 %v2896_v3, %v2267_v2  ;;  %v2845_v11 = vld [vmem:[#allocation2 + $0xe0] sm:$0xf0]  ;;  %v1968_v16 = vor.u32 %v2821_v8, %v1967_v7  ;;  %v1955_v17 = vld [vmem:[#allocation2] sm:$0xf] }
  0x1e   :  { %1413 = vmatpush.bf16.msra.mxu3 %v2292_v50  ;;  %v2159_v12 = vld [vmem:[#allocation2 + $0x198] sm:$0xf]  ;;  %v2869_v13 = vld [vmem:[#allocation2 + $0x1a0] sm:$0xf0]  ;;  %v2818_v18 = vld [vmem:[#allocation2 + $0x8] sm:$0xf0]  ;;  %v2064_v19 = vor.u32 %v2845_v11, %v2063_v9 }
  0x1f   :  { %1375 = vmatpush.bf16.msra.mxu0 %v1992_v56  ;;  %v2255_v14 = vld [vmem:[#allocation2 + $0x258] sm:$0xf]  ;;  %v2893_v15 = vld [vmem:[#allocation2 + $0x260] sm:$0xf0]  ;;  %v2160_v20 = vor.u32 %v2869_v13, %v2159_v12  ;;  %v2051_v21 = vld [vmem:[#allocation2 + $0xc0] sm:$0xf]  ;;  %v1956_v31 = vor.u32 %v2818_v18, %v1955_v17 }
  0x20   :  { %1388 = vmatpush.bf16.msra.mxu1 %v2088_v57  ;;  %v2842_v22 = vld [vmem:[#allocation2 + $0xc8] sm:$0xf0]  ;;  %v2147_v23 = vld [vmem:[#allocation2 + $0x180] sm:$0xf]  ;;  %v2256_v24 = vor.u32 %v2893_v15, %v2255_v14  ;;  %v2423_v28 = vld [vmem:[#allocation2 + $0x3a8] sm:$0xf] }
  0x21   :  { %1401 = vmatpush.bf16.msra.mxu2 %v2184_v58  ;;  %v2866_v25 = vld [vmem:[#allocation2 + $0x188] sm:$0xf0]  ;;  %v2243_v26 = vld [vmem:[#allocation2 + $0x240] sm:$0xf]  ;;  %v2935_v29 = vld [vmem:[#allocation2 + $0x3b0] sm:$0xf0]  ;;  %v2052_v35 = vor.u32 %v2842_v22, %v2051_v21 }
  0x22   :  { %1414 = vmatpush.bf16.msra.mxu3 %v2280_v62  ;;  %v2890_v27 = vld [vmem:[#allocation2 + $0x248] sm:$0xf0]  ;;  %v2519_v30 = vld [vmem:[#allocation2 + $0x468] sm:$0xf]  ;;  %v2959_v32 = vld [vmem:[#allocation2 + $0x470] sm:$0xf0]  ;;  %v2148_v36 = vor.u32 %v2866_v25, %v2147_v23  ;;  %v2424_v40 = vor.u32 %v2935_v29, %v2423_v28 }
  0x23   :  { %1376 = vmatpush.bf16.msra.mxu0 %v1980_v4  ;;  %v2615_v33 = vld [vmem:[#allocation2 + $0x528] sm:$0xf]  ;;  %v2983_v34 = vld [vmem:[#allocation2 + $0x530] sm:$0xf0]  ;;  %v2244_v39 = vor.u32 %v2890_v27, %v2243_v26  ;;  %v2520_v41 = vor.u32 %v2959_v32, %v2519_v30  ;;  %v2411_v43 = vld [vmem:[#allocation2 + $0x390] sm:$0xf] }
  0x24   :  { %1389 = vmatpush.bf16.msra.mxu1 %v2076_v5  ;;  %v2711_v37 = vld [vmem:[#allocation2 + $0x5e8] sm:$0xf]  ;;  %v3007_v38 = vld [vmem:[#allocation2 + $0x5f0] sm:$0xf0]  ;;  %v2616_v42 = vor.u32 %v2983_v34, %v2615_v33  ;;  %v2932_v44 = vld [vmem:[#allocation2 + $0x398] sm:$0xf0] }
  0x25   :  { %1402 = vmatpush.bf16.msra.mxu2 %v2172_v6  ;;  %v2507_v45 = vld [vmem:[#allocation2 + $0x450] sm:$0xf]  ;;  %v2712_v46 = vor.u32 %v3007_v38, %v2711_v37  ;;  %v2956_v47 = vld [vmem:[#allocation2 + $0x458] sm:$0xf0]  ;;  %v2412_v52 = vor.u32 %v2932_v44, %v2411_v43  ;;  %v2399_v55 = vld [vmem:[#allocation2 + $0x378] sm:$0xf] }
  0x26   :  { %1415 = vmatpush.bf16.msra.mxu3 %v2268_v10  ;;  %v2603_v48 = vld [vmem:[#allocation2 + $0x510] sm:$0xf]  ;;  %v2980_v49 = vld [vmem:[#allocation2 + $0x518] sm:$0xf0]  ;;  %v2508_v53 = vor.u32 %v2956_v47, %v2507_v45  ;;  %v2929_v56 = vld [vmem:[#allocation2 + $0x380] sm:$0xf0] }
  0x27   :  { %1377 = vmatpush.bf16.msra.mxu0 %v1968_v16  ;;  %v2699_v50 = vld [vmem:[#allocation2 + $0x5d0] sm:$0xf]  ;;  %v3004_v51 = vld [vmem:[#allocation2 + $0x5d8] sm:$0xf0]  ;;  %v2604_v54 = vor.u32 %v2980_v49, %v2603_v48  ;;  %v2495_v57 = vld [vmem:[#allocation2 + $0x438] sm:$0xf]  ;;  %v2400_v0 = vor.u32 %v2929_v56, %v2399_v55 }
  0x28   :  { %1390 = vmatpush.bf16.msra.mxu1 %v2064_v19  ;;  %v2700_v58 = vor.u32 %v3004_v51, %v2699_v50  ;;  %v2953_v59 = vld [vmem:[#allocation2 + $0x440] sm:$0xf0]  ;;  %v2591_v60 = vld [vmem:[#allocation2 + $0x4f8] sm:$0xf]  ;;  %v2387_v1 = vld [vmem:[#allocation2 + $0x360] sm:$0xf] }
  0x29   :  { %1403 = vmatpush.bf16.msra.mxu2 %v2160_v20  ;;  %v2977_v61 = vld [vmem:[#allocation2 + $0x500] sm:$0xf0]  ;;  %v2687_v62 = vld [vmem:[#allocation2 + $0x5b8] sm:$0xf]  ;;  %v2496_v3 = vor.u32 %v2953_v59, %v2495_v57  ;;  %v2926_v5 = vld [vmem:[#allocation2 + $0x368] sm:$0xf0] }
  0x2a   :  { %1416 = vmatpush.bf16.msra.mxu3 %v2256_v24  ;;  %v3001_v63 = vld [vmem:[#allocation2 + $0x5c0] sm:$0xf0]  ;;  %v52_v2 = vld [vmem:[%s3193_s0] sm:$0xff]  ;;  %v2592_v4 = vor.u32 %v2977_v61, %v2591_v60  ;;  %v2483_v6 = vld [vmem:[#allocation2 + $0x420] sm:$0xf]  ;;  %v2388_v13 = vor.u32 %v2926_v5, %v2387_v1  ;;  %vm1941_vm0 = vcmask 1041408  }
  0x2b   :  { %1378 = vmatpush.bf16.msra.mxu0 %v1956_v31  ;;  %56 = vst [vmem:[#allocation1] ss:$4 sm:$0xff] %v52_v2  ;;  %v2688_v7 = vor.u32 %v3001_v63, %v2687_v62  ;;  %v2950_v8 = vld [vmem:[#allocation2 + $0x428] sm:$0xf0]  ;;  %v2579_v9 = vld [vmem:[#allocation2 + $0x4e0] sm:$0xf] }
  0x2c   :  { %1391 = vmatpush.bf16.msra.mxu1 %v2052_v35  ;;  %v2974_v10 = vld [vmem:[#allocation2 + $0x4e8] sm:$0xf0]  ;;  %v2675_v11 = vld [vmem:[#allocation2 + $0x5a0] sm:$0xf]  ;;  %v2375_v14 = vld [vmem:[#allocation2 + $0x348] sm:$0xf]  ;;  %v2484_v15 = vor.u32 %v2950_v8, %v2483_v6 }
  0x2d   :  { %1404 = vmatpush.bf16.msra.mxu2 %v2148_v36  ;;  %v2998_v12 = vld [vmem:[#allocation2 + $0x5a8] sm:$0xf0]  ;;  %v2580_v16 = vor.u32 %v2974_v10, %v2579_v9  ;;  %v2923_v17 = vld [vmem:[#allocation2 + $0x350] sm:$0xf0]  ;;  %v2471_v18 = vld [vmem:[#allocation2 + $0x408] sm:$0xf] }
  0x2e   :  { %1417 = vmatpush.bf16.msra.mxu3 %v2244_v39  ;;  %v2947_v19 = vld [vmem:[#allocation2 + $0x410] sm:$0xf0]  ;;  %v2676_v20 = vor.u32 %v2998_v12, %v2675_v11  ;;  %v2567_v21 = vld [vmem:[#allocation2 + $0x4c8] sm:$0xf]  ;;  %v2363_v25 = vld [vmem:[#allocation2 + $0x330] sm:$0xf]  ;;  %v2376_v27 = vor.u32 %v2923_v17, %v2375_v14 }
  0x2f   :  { %1423 = vmatpush.bf16.msrb.mxu0 %v2424_v40  ;;  %v2971_v22 = vld [vmem:[#allocation2 + $0x4d0] sm:$0xf0]  ;;  %v2663_v23 = vld [vmem:[#allocation2 + $0x588] sm:$0xf]  ;;  %v2920_v26 = vld [vmem:[#allocation2 + $0x338] sm:$0xf0]  ;;  %v2472_v28 = vor.u32 %v2947_v19, %v2471_v18 }
  0x30   :  { %1436 = vmatpush.bf16.msrb.mxu1 %v2520_v41  ;;  %v2995_v24 = vld [vmem:[#allocation2 + $0x590] sm:$0xf0]  ;;  %v2459_v29 = vld [vmem:[#allocation2 + $0x3f0] sm:$0xf]  ;;  %v2568_v32 = vor.u32 %v2971_v22, %v2567_v21  ;;  %v2944_v38 = vld [vmem:[#allocation2 + $0x3f8] sm:$0xf0]  ;;  %v2364_v45 = vor.u32 %v2920_v26, %v2363_v25 }
  0x31   :  { %1449 = vmatpush.bf16.msrb.mxu2 %v2616_v42  ;;  %v2664_v37 = vor.u32 %v2995_v24, %v2663_v23  ;;  %v2555_v39 = vld [vmem:[#allocation2 + $0x4b0] sm:$0xf]  ;;  %v2968_v40 = vld [vmem:[#allocation2 + $0x4b8] sm:$0xf0]  ;;  %v2917_v47 = vld [vmem:[#allocation2 + $0x320] sm:$0xf0]  ;;  %v2460_v48 = vor.u32 %v2944_v38, %v2459_v29 }
  0x32   :  { %1462 = vmatpush.bf16.msrb.mxu3 %v2712_v46  ;;  %v61_v30 = vld.sshfl [vmem:[#allocation1 + $0x10] sm:$0xff pattern:$0x73625140]  ;;  %v59_v31 = vld.sshfl [vmem:[#allocation1] sm:$0xff pattern:$0x73625140]  ;;  %v2556_v49 = vor.u32 %v2968_v40, %v2555_v39 }
  0x33   :  { %1424 = vmatpush.bf16.msrb.mxu0 %v2412_v52  ;;  %v3136_v33 = vpack.c.bf16 %v61_v30, %v61_v30  ;;  %v3138_v34 = vpack.c.bf16 %v59_v31, %v59_v31  ;;  %v62_v35 = vld.sshfl [vmem:[#allocation1 + $0x18] sm:$0xff pattern:$0x73625140]  ;;  %v60_v36 = vld.sshfl [vmem:[#allocation1 + $0x8] sm:$0xff pattern:$0x73625140] }
  0x34   :  { %1437 = vmatpush.bf16.msrb.mxu1 %v2508_v53  ;;  %v3140_v41 = vpack.c.bf16 %v62_v35, %v62_v35  ;;  %v3142_v42 = vpack.c.bf16 %v60_v36, %v60_v36  ;;  %v2651_v43 = vld [vmem:[#allocation2 + $0x570] sm:$0xf]  ;;  %v2992_v44 = vld [vmem:[#allocation2 + $0x578] sm:$0xf0]  ;;  %v2351_v46 = vld [vmem:[#allocation2 + $0x318] sm:$0xf] }
  0x35   :  { %1450 = vmatpush.bf16.msrb.mxu2 %v2604_v54  ;;  %1379 = vmatmul.bf16.vlgmr.msra.gmra.mxu0 %v3138_v34  ;;  %v2447_v50 = vld [vmem:[#allocation2 + $0x3d8] sm:$0xf]  ;;  %v2941_v51 = vld [vmem:[#allocation2 + $0x3e0] sm:$0xf0]  ;;  %v2652_v53 = vor.u32 %v2992_v44, %v2651_v43  ;;  %v2352_v59 = vor.u32 %v2917_v47, %v2351_v46  ;;  %v2914_v60 = vld [vmem:[#allocation2 + $0x308] sm:$0xf0] }
  0x36   :  { %1463 = vmatpush.bf16.msrb.mxu3 %v2700_v58  ;;  %1405 = vmatmul.bf16.vlgmr.msra.gmra.mxu2 %v3136_v33  ;;  %v53_v52 = vld [vmem:[%s3193_s0 + $0x8] sm:$0xff]  ;;  %v2543_v54 = vld [vmem:[#allocation2 + $0x498] sm:$0xf]  ;;  %v2938_v62 = vld [vmem:[#allocation2 + $0x3c8] sm:$0xf0]  ;;  %v2448_v63 = vor.u32 %v2941_v51, %v2447_v50  ;;  %vm1943_vm1 = vcmask 1043456  }
  0x37   :  { %1425 = vmatpush.bf16.msrb.mxu0 %v2400_v0  ;;  %1418 = vmatmul.bf16.vlgmr.msra.gmra.mxu3 %v3140_v41  ;;  %v2965_v55 = vld [vmem:[#allocation2 + $0x4a0] sm:$0xf0]  ;;  %58 = vst [vmem:[#allocation1 + $0x20] ss:$4 sm:$0xff] %v53_v52  ;;  %v2639_v56 = vld [vmem:[#allocation2 + $0x558] sm:$0xf] }
  0x38   :  { %1438 = vmatpush.bf16.msrb.mxu1 %v2496_v3  ;;  %v2989_v57 = vld [vmem:[#allocation2 + $0x560] sm:$0xf0]  ;;  %v2339_v58 = vld [vmem:[#allocation2 + $0x300] sm:$0xf]  ;;  %v2544_v0 = vor.u32 %v2965_v55, %v2543_v54  ;;  %v2962_v2 = vld [vmem:[#allocation2 + $0x488] sm:$0xf0] }
  0x39   :  { %1451 = vmatpush.bf16.msrb.mxu2 %v2592_v4  ;;  %1392 = vmatmul.bf16.vlgmr.msra.gmra.mxu1 %v3142_v42  ;;  %v2435_v61 = vld [vmem:[#allocation2 + $0x3c0] sm:$0xf]  ;;  %v2640_v4 = vor.u32 %v2989_v57, %v2639_v56  ;;  %v2986_v5 = vld [vmem:[#allocation2 + $0x548] sm:$0xf0]  ;;  %v2137_v9 = vld [vmem:[#allocation2 + $0x174] sm:$0xf0]  ;;  %v2340_v11 = vor.u32 %v2914_v60, %v2339_v58 }
  0x3a   :  { %1464 = vmatpush.bf16.msrb.mxu3 %v2688_v7  ;;  %v2531_v1 = vld [vmem:[#allocation2 + $0x480] sm:$0xf]  ;;  %v2838_v6 = vld [vmem:[#allocation2 + $0xac] sm:$0xf]  ;;  %v2041_v7 = vld [vmem:[#allocation2 + $0xb4] sm:$0xf0] }
  0x3b   :  { %1426 = vmatpush.bf16.msrb.mxu0 %v2388_v13  ;;  %v2627_v3 = vld [vmem:[#allocation2 + $0x540] sm:$0xf]  ;;  %v2862_v8 = vld [vmem:[#allocation2 + $0x16c] sm:$0xf]  ;;  %v2233_v12 = vld [vmem:[#allocation2 + $0x234] sm:$0xf0]  ;;  %v2044_v21 = vor.u32 %v2838_v6, %v2041_v7 }
  0x3c   :  { %1439 = vmatpush.bf16.msrb.mxu1 %v2484_v15  ;;  %v2886_v10 = vld [vmem:[#allocation2 + $0x22c] sm:$0xf]  ;;  %v2329_v14 = vld [vmem:[#allocation2 + $0x2f4] sm:$0xf0]  ;;  %v2436_v15 = vor.u32 %v2938_v62, %v2435_v61  ;;  %v2835_v17 = vld [vmem:[#allocation2 + $0x94] sm:$0xf]  ;;  %v2140_v24 = vor.u32 %v2862_v8, %v2137_v9 }
  0x3d   :  { %1452 = vmatpush.bf16.msrb.mxu2 %v2580_v16  ;;  %v2910_v13 = vld [vmem:[#allocation2 + $0x2ec] sm:$0xf]  ;;  %v2532_v16 = vor.u32 %v2962_v2, %v2531_v1  ;;  %v2029_v18 = vld [vmem:[#allocation2 + $0x9c] sm:$0xf0]  ;;  %v2236_v25 = vor.u32 %v2886_v10, %v2233_v12  ;;  %v2859_v26 = vld [vmem:[#allocation2 + $0x154] sm:$0xf] }
  0x3e   :  { %1465 = vmatpush.bf16.msrb.mxu3 %v2676_v20  ;;  %v65_v19 = vld.sshfl [vmem:[#allocation1 + $0x30] sm:$0xff pattern:$0x73625140]  ;;  %v2628_v20 = vor.u32 %v2986_v5, %v2627_v3  ;;  %v63_v22 = vld.sshfl [vmem:[#allocation1 + $0x20] sm:$0xff pattern:$0x73625140]  ;;  %v2032_v39 = vor.u32 %v2835_v17, %v2029_v18 }
  0x3f   :  { %1427 = vmatpush.bf16.msrb.mxu0 %v2376_v27  ;;  %v66_v23 = vld.sshfl [vmem:[#allocation1 + $0x38] sm:$0xff pattern:$0x73625140]  ;;  %v64_v27 = vld.sshfl [vmem:[#allocation1 + $0x28] sm:$0xff pattern:$0x73625140] }
  0x40   :  { %1440 = vmatpush.bf16.msrb.mxu1 %v2472_v28  ;;  %v2332_v28 = vor.u32 %v2910_v13, %v2329_v14  ;;  %v2125_v29 = vld [vmem:[#allocation2 + $0x15c] sm:$0xf0]  ;;  %v2883_v30 = vld [vmem:[#allocation2 + $0x214] sm:$0xf]  ;;  %v3155_v38 = vpack.c.bf16 %v66_v23, %v66_v23  ;;  %v3157_v40 = vpack.c.bf16 %v64_v27, %v64_v27  ;;  %v2017_v46 = vld [vmem:[#allocation2 + $0x84] sm:$0xf0] }
  0x41   :  { %1453 = vmatpush.bf16.msrb.mxu2 %v2568_v32  ;;  %v2221_v31 = vld [vmem:[#allocation2 + $0x21c] sm:$0xf0]  ;;  %v3151_v32 = vpack.c.bf16 %v65_v19, %v65_v19  ;;  %v2907_v35 = vld [vmem:[#allocation2 + $0x2d4] sm:$0xf]  ;;  %v2128_v43 = vor.u32 %v2859_v26, %v2125_v29  ;;  %v2856_v47 = vld [vmem:[#allocation2 + $0x13c] sm:$0xf] }
  0x42   :  { %1466 = vmatpush.bf16.msrb.mxu3 %v2664_v37  ;;  %v2317_v36 = vld [vmem:[#allocation2 + $0x2dc] sm:$0xf0]  ;;  %v3153_v37 = vpack.c.bf16 %v63_v22, %v63_v22  ;;  %v2224_v44 = vor.u32 %v2883_v30, %v2221_v31  ;;  %v2880_v50 = vld [vmem:[#allocation2 + $0x1fc] sm:$0xf]  ;;  %v2209_v51 = vld [vmem:[#allocation2 + $0x204] sm:$0xf0] }
  0x43   :  { %1428 = vmatpush.bf16.msrb.mxu0 %v2364_v45  ;;  %v2832_v45 = vld [vmem:[#allocation2 + $0x7c] sm:$0xf]  ;;  %v2212_v56 = vor.u32 %v2880_v50, %v2209_v51  ;;  %v2829_v57 = vld [vmem:[#allocation2 + $0x64] sm:$0xf]  ;;  %v2005_v58 = vld [vmem:[#allocation2 + $0x6c] sm:$0xf0] }
  0x44   :  { %1441 = vmatpush.bf16.msrb.mxu1 %v2460_v48  ;;  %v2320_v48 = vor.u32 %v2907_v35, %v2317_v36  ;;  %v2904_v52 = vld [vmem:[#allocation2 + $0x2bc] sm:$0xf]  ;;  %v2020_v54 = vor.u32 %v2832_v45, %v2017_v46  ;;  %v2101_v61 = vld [vmem:[#allocation2 + $0x12c] sm:$0xf0]  ;;  %v2877_v62 = vld [vmem:[#allocation2 + $0x1e4] sm:$0xf]  ;;  %v2008_v2 = vor.u32 %v2829_v57, %v2005_v58 }
  0x45   :  { %1454 = vmatpush.bf16.msrb.mxu2 %v2556_v49  ;;  %v2113_v49 = vld [vmem:[#allocation2 + $0x144] sm:$0xf0]  ;;  %v2293_v1 = vld [vmem:[#allocation2 + $0x2ac] sm:$0xf0]  ;;  %v2826_v5 = vld [vmem:[#allocation2 + $0x4c] sm:$0xf] }
  0x46   :  { %1467 = vmatpush.bf16.msrb.mxu3 %v2652_v53  ;;  %v2305_v53 = vld [vmem:[#allocation2 + $0x2c4] sm:$0xf0]  ;;  %v2116_v55 = vor.u32 %v2856_v47, %v2113_v49  ;;  %v1993_v6 = vld [vmem:[#allocation2 + $0x54] sm:$0xf0]  ;;  %v2850_v7 = vld [vmem:[#allocation2 + $0x10c] sm:$0xf] }
  0x47   :  { %1429 = vmatpush.bf16.msrb.mxu0 %v2352_v59  ;;  %v2853_v59 = vld [vmem:[#allocation2 + $0x124] sm:$0xf]  ;;  %v2308_v60 = vor.u32 %v2904_v52, %v2305_v53  ;;  %v2089_v9 = vld [vmem:[#allocation2 + $0x114] sm:$0xf0]  ;;  %v2874_v10 = vld [vmem:[#allocation2 + $0x1cc] sm:$0xf]  ;;  %v1996_v14 = vor.u32 %v2826_v5, %v1993_v6 }
  0x48   :  { %1442 = vmatpush.bf16.msrb.mxu1 %v2448_v63  ;;  %v2197_v63 = vld [vmem:[#allocation2 + $0x1ec] sm:$0xf0]  ;;  %v2104_v3 = vor.u32 %v2853_v59, %v2101_v61  ;;  %v2898_v12 = vld [vmem:[#allocation2 + $0x28c] sm:$0xf]  ;;  %v2281_v13 = vld [vmem:[#allocation2 + $0x294] sm:$0xf0] }
  0x49   :  { %1455 = vmatpush.bf16.msrb.mxu2 %v2544_v0  ;;  %v2901_v0 = vld [vmem:[#allocation2 + $0x2a4] sm:$0xf]  ;;  %v2823_v17 = vld [vmem:[#allocation2 + $0x34] sm:$0xf]  ;;  %v1981_v18 = vld [vmem:[#allocation2 + $0x3c] sm:$0xf0] }
  0x4a   :  { %1468 = vmatpush.bf16.msrb.mxu3 %v2640_v4  ;;  %v2200_v4 = vor.u32 %v2877_v62, %v2197_v63  ;;  %v2296_v8 = vor.u32 %v2901_v0, %v2293_v1  ;;  %v2847_v19 = vld [vmem:[#allocation2 + $0xf4] sm:$0xf]  ;;  %v2173_v23 = vld [vmem:[#allocation2 + $0x1bc] sm:$0xf0]  ;;  %v1984_v26 = vor.u32 %v2823_v17, %v1981_v18  ;;  %v2820_v29 = vld [vmem:[#allocation2 + $0x1c] sm:$0xf] }
  0x4b   :  { %1430 = vmatpush.bf16.msrb.mxu0 %v2340_v11  ;;  %v2185_v11 = vld [vmem:[#allocation2 + $0x1d4] sm:$0xf0]  ;;  %v2871_v22 = vld [vmem:[#allocation2 + $0x1b4] sm:$0xf]  ;;  %v1969_v30 = vld [vmem:[#allocation2 + $0x24] sm:$0xf0] }
  0x4c   :  { %1443 = vmatpush.bf16.msrb.mxu1 %v2436_v15  ;;  %v2092_v15 = vor.u32 %v2850_v7, %v2089_v9  ;;  %v2844_v31 = vld [vmem:[#allocation2 + $0xdc] sm:$0xf]  ;;  %v2065_v36 = vld [vmem:[#allocation2 + $0xe4] sm:$0xf0]  ;;  %v1972_v46 = vor.u32 %v2820_v29, %v1969_v30  ;;  %v2817_v47 = vld [vmem:[#allocation2 + $0x4] sm:$0xf] }
  0x4d   :  { %1456 = vmatpush.bf16.msrb.mxu2 %v2532_v16  ;;  %v2188_v16 = vor.u32 %v2874_v10, %v2185_v11  ;;  %v2257_v45 = vld [vmem:[#allocation2 + $0x264] sm:$0xf0]  ;;  %v2068_v49 = vor.u32 %v2844_v31, %v2065_v36  ;;  %v2841_v51 = vld [vmem:[#allocation2 + $0xc4] sm:$0xf]  ;;  %v2053_v52 = vld [vmem:[#allocation2 + $0xcc] sm:$0xf0] }
  0x4e   :  { %1469 = vmatpush.bf16.msrb.mxu3 %v2628_v20  ;;  %1431 = vmatmul.bf16.vlgmr.msrb.gmra.mxu0 %v3153_v37  ;;  %v2284_v20 = vor.u32 %v2898_v12, %v2281_v13  ;;  %v2865_v53 = vld [vmem:[#allocation2 + $0x184] sm:$0xf]  ;;  %v2245_v57 = vld [vmem:[#allocation2 + $0x24c] sm:$0xf0]  ;;  %v2934_v58 = vld [vmem:[#allocation2 + $0x3ac] sm:$0xf]  ;;  %v2056_v1 = vor.u32 %v2841_v51, %v2053_v52 }
  0x4f   :  { %1475 = vmatpush.bf16.msra.mxu0 %v2044_v21  ;;  %1444 = vmatmul.bf16.vlgmr.msrb.gmra.mxu1 %v3157_v40  ;;  %v2077_v21 = vld [vmem:[#allocation2 + $0xfc] sm:$0xf0]  ;;  %v2425_v59 = vld [vmem:[#allocation2 + $0x3b4] sm:$0xf0]  ;;  %v2982_v63 = vld [vmem:[#allocation2 + $0x52c] sm:$0xf] }
  0x50   :  { %1488 = vmatpush.bf16.msra.mxu1 %v2140_v24  ;;  %1457 = vmatmul.bf16.vlgmr.msrb.gmra.mxu2 %v3151_v32  ;;  %v2895_v24 = vld [vmem:[#allocation2 + $0x274] sm:$0xf]  ;;  %v2080_v27 = vor.u32 %v2847_v19, %v2077_v21  ;;  %v2521_v62 = vld [vmem:[#allocation2 + $0x474] sm:$0xf0]  ;;  %v2428_v6 = vor.u32 %v2934_v58, %v2425_v59  ;;  %v2413_v10 = vld [vmem:[#allocation2 + $0x39c] sm:$0xf0] }
  0x51   :  { %1501 = vmatpush.bf16.msra.mxu2 %v2236_v25  ;;  %1470 = vmatmul.bf16.vlgmr.msrb.gmra.mxu3 %v3155_v38  ;;  %v2269_v25 = vld [vmem:[#allocation2 + $0x27c] sm:$0xf0]  ;;  %v2617_v0 = vld [vmem:[#allocation2 + $0x534] sm:$0xf0]  ;;  %v2931_v9 = vld [vmem:[#allocation2 + $0x394] sm:$0xf] }
  0x52   :  { %1514 = vmatpush.bf16.msra.mxu3 %v2332_v28  ;;  %v2176_v28 = vor.u32 %v2871_v22, %v2173_v23  ;;  %v2272_v35 = vor.u32 %v2895_v24, %v2269_v25  ;;  %v2955_v11 = vld [vmem:[#allocation2 + $0x454] sm:$0xf]  ;;  %v2509_v13 = vld [vmem:[#allocation2 + $0x45c] sm:$0xf0]  ;;  %v2416_v18 = vor.u32 %v2931_v9, %v2413_v10  ;;  %v2928_v21 = vld [vmem:[#allocation2 + $0x37c] sm:$0xf] }
  0x53   :  { %1476 = vmatpush.bf16.msra.mxu0 %v2032_v39  ;;  %v2868_v39 = vld [vmem:[#allocation2 + $0x19c] sm:$0xf]  ;;  %v2701_v17 = vld [vmem:[#allocation2 + $0x5dc] sm:$0xf0]  ;;  %v2512_v19 = vor.u32 %v2955_v11, %v2509_v13  ;;  %v2401_v22 = vld [vmem:[#allocation2 + $0x384] sm:$0xf0] }
  0x54   :  { %1489 = vmatpush.bf16.msra.mxu1 %v2128_v43  ;;  %v2161_v43 = vld [vmem:[#allocation2 + $0x1a4] sm:$0xf0]  ;;  %v2952_v23 = vld [vmem:[#allocation2 + $0x43c] sm:$0xf]  ;;  %v2404_v30 = vor.u32 %v2928_v21, %v2401_v22  ;;  %v2925_v36 = vld [vmem:[#allocation2 + $0x364] sm:$0xf] }
  0x55   :  { %1502 = vmatpush.bf16.msra.mxu2 %v2224_v44  ;;  %v2892_v44 = vld [vmem:[#allocation2 + $0x25c] sm:$0xf]  ;;  %v2164_v50 = vor.u32 %v2868_v39, %v2161_v43  ;;  %v2497_v25 = vld [vmem:[#allocation2 + $0x444] sm:$0xf0]  ;;  %v2389_v39 = vld [vmem:[#allocation2 + $0x36c] sm:$0xf0] }
  0x56   :  { %1515 = vmatpush.bf16.msra.mxu3 %v2320_v48  ;;  %v1957_v48 = vld [vmem:[#allocation2 + $0xc] sm:$0xf0]  ;;  %v2689_v29 = vld [vmem:[#allocation2 + $0x5c4] sm:$0xf0]  ;;  %v2500_v31 = vor.u32 %v2952_v23, %v2497_v25  ;;  %v2949_v43 = vld [vmem:[#allocation2 + $0x424] sm:$0xf] }
  0x57   :  { %1477 = vmatpush.bf16.msra.mxu0 %v2020_v54  ;;  %v2260_v54 = vor.u32 %v2892_v44, %v2257_v45  ;;  %v1960_v61 = vor.u32 %v2817_v47, %v1957_v48  ;;  %v2485_v45 = vld [vmem:[#allocation2 + $0x42c] sm:$0xf0]  ;;  %v2997_v48 = vld [vmem:[#allocation2 + $0x5a4] sm:$0xf]  ;;  %v2970_v58 = vld [vmem:[#allocation2 + $0x4cc] sm:$0xf] }
  0x58   :  { %1490 = vmatpush.bf16.msra.mxu1 %v2116_v55  ;;  %v2149_v55 = vld [vmem:[#allocation2 + $0x18c] sm:$0xf0]  ;;  %v2488_v51 = vor.u32 %v2949_v43, %v2485_v45  ;;  %v2569_v59 = vld [vmem:[#allocation2 + $0x4d4] sm:$0xf0]  ;;  %v2653_v9 = vld [vmem:[#allocation2 + $0x57c] sm:$0xf0] }
  0x59   :  { %1503 = vmatpush.bf16.msra.mxu2 %v2212_v56  ;;  %v2889_v56 = vld [vmem:[#allocation2 + $0x244] sm:$0xf]  ;;  %v2581_v47 = vld [vmem:[#allocation2 + $0x4ec] sm:$0xf0]  ;;  %v2916_v13 = vld [vmem:[#allocation2 + $0x31c] sm:$0xf] }
  0x5a   :  { %1516 = vmatpush.bf16.msra.mxu3 %v2308_v60  ;;  %v2958_v60 = vld [vmem:[#allocation2 + $0x46c] sm:$0xf]  ;;  %v2248_v5 = vor.u32 %v2889_v56, %v2245_v57  ;;  %v2473_v57 = vld [vmem:[#allocation2 + $0x414] sm:$0xf0]  ;;  %v2641_v21 = vld [vmem:[#allocation2 + $0x564] sm:$0xf0] }
  0x5b   :  { %1478 = vmatpush.bf16.msra.mxu0 %v2008_v2  ;;  %v2152_v2 = vor.u32 %v2865_v53, %v2149_v55  ;;  %v2524_v7 = vor.u32 %v2958_v60, %v2521_v62  ;;  %v2922_v53 = vld [vmem:[#allocation2 + $0x34c] sm:$0xf]  ;;  %v2913_v23 = vld [vmem:[#allocation2 + $0x304] sm:$0xf]  ;;  %v2840_v43 = vld [vmem:[#allocation2 + $0xb8] sm:$0xf0] }
  0x5c   :  { %1491 = vmatpush.bf16.msra.mxu1 %v2104_v3  ;;  %v3006_v3 = vld [vmem:[#allocation2 + $0x5ec] sm:$0xf] }
  0x5d   :  { %1504 = vmatpush.bf16.msra.mxu2 %v2200_v4  ;;  %v2713_v4 = vld [vmem:[#allocation2 + $0x5f4] sm:$0xf0]  ;;  %v2946_v55 = vld [vmem:[#allocation2 + $0x40c] sm:$0xf] }
  0x5e   :  { %1517 = vmatpush.bf16.msra.mxu3 %v2296_v8  ;;  %v2620_v8 = vor.u32 %v2982_v63, %v2617_v0  ;;  %v2716_v12 = vor.u32 %v3006_v3, %v2713_v4  ;;  %v2994_v60 = vld [vmem:[#allocation2 + $0x58c] sm:$0xf]  ;;  %v2476_v63 = vor.u32 %v2946_v55, %v2473_v57  ;;  %v2572_v0 = vor.u32 %v2970_v58, %v2569_v59  ;;  %v2943_v3 = vld [vmem:[#allocation2 + $0x3f4] sm:$0xf]  ;;  %v2035_v57 = vld [vmem:[#allocation2 + $0x98] sm:$0xf] }
  0x5f   :  { %1479 = vmatpush.bf16.msra.mxu0 %v1996_v14  ;;  %v2979_v14 = vld [vmem:[#allocation2 + $0x514] sm:$0xf]  ;;  %v2837_v58 = vld [vmem:[#allocation2 + $0xa0] sm:$0xf0]  ;;  %v2131_v59 = vld [vmem:[#allocation2 + $0x158] sm:$0xf] }
  0x60   :  { %1492 = vmatpush.bf16.msra.mxu1 %v2092_v15  ;;  %v2605_v15 = vld [vmem:[#allocation2 + $0x51c] sm:$0xf0] }
  0x61   :  { %1505 = vmatpush.bf16.msra.mxu2 %v2188_v16  ;;  %v3003_v16 = vld [vmem:[#allocation2 + $0x5d4] sm:$0xf] }
  0x62   :  { %1518 = vmatpush.bf16.msra.mxu3 %v2284_v20  ;;  %v2608_v20 = vor.u32 %v2979_v14, %v2605_v15  ;;  %v2704_v24 = vor.u32 %v3003_v16, %v2701_v17  ;;  %v2353_v14 = vld [vmem:[#allocation2 + $0x324] sm:$0xf0]  ;;  %v2940_v15 = vld [vmem:[#allocation2 + $0x3dc] sm:$0xf] }
  0x63   :  { %1480 = vmatpush.bf16.msra.mxu0 %v1984_v26  ;;  %v2976_v26 = vld [vmem:[#allocation2 + $0x4fc] sm:$0xf]  ;;  %v2449_v17 = vld [vmem:[#allocation2 + $0x3e4] sm:$0xf0]  ;;  %v2356_v22 = vor.u32 %v2916_v13, %v2353_v14  ;;  %v2906_v13 = vld [vmem:[#allocation2 + $0x2c8] sm:$0xf0] }
  0x64   :  { %1493 = vmatpush.bf16.msra.mxu1 %v2080_v27  ;;  %v2593_v27 = vld [vmem:[#allocation2 + $0x504] sm:$0xf0]  ;;  %v2452_v25 = vor.u32 %v2940_v15, %v2449_v17 }
  0x65   :  { %1506 = vmatpush.bf16.msra.mxu2 %v2176_v28  ;;  %v3000_v28 = vld [vmem:[#allocation2 + $0x5bc] sm:$0xf]  ;;  %v2011_v17 = vld [vmem:[#allocation2 + $0x68] sm:$0xf] }
  0x66   :  { %1519 = vmatpush.bf16.msra.mxu3 %v2272_v35  ;;  %v2596_v35 = vor.u32 %v2976_v26, %v2593_v27  ;;  %v2692_v44 = vor.u32 %v3000_v28, %v2689_v29  ;;  %v2937_v27 = vld [vmem:[#allocation2 + $0x3c4] sm:$0xf]  ;;  %v2437_v28 = vld [vmem:[#allocation2 + $0x3cc] sm:$0xf0] }
  0x67   :  { %1481 = vmatpush.bf16.msra.mxu0 %v1972_v46  ;;  %v2973_v46 = vld [vmem:[#allocation2 + $0x4e4] sm:$0xf] }
  0x68   :  { %1494 = vmatpush.bf16.msra.mxu1 %v2068_v49  ;;  %v2677_v49 = vld [vmem:[#allocation2 + $0x5ac] sm:$0xf0]  ;;  %v2584_v52 = vor.u32 %v2973_v46, %v2581_v47  ;;  %v2961_v29 = vld [vmem:[#allocation2 + $0x484] sm:$0xf]  ;;  %v2864_v46 = vld [vmem:[#allocation2 + $0x178] sm:$0xf0] }
  0x69   :  { %1507 = vmatpush.bf16.msra.mxu2 %v2164_v50  ;;  %v2392_v50 = vor.u32 %v2925_v36, %v2389_v39  ;;  %v2680_v56 = vor.u32 %v2997_v48, %v2677_v49  ;;  %v2629_v36 = vld [vmem:[#allocation2 + $0x54c] sm:$0xf0]  ;;  %v2888_v48 = vld [vmem:[#allocation2 + $0x238] sm:$0xf0]  ;;  %v2440_v49 = vor.u32 %v2937_v27, %v2437_v28 }
  0x6a   :  { %1520 = vmatpush.bf16.msra.mxu3 %v2260_v54  ;;  %v2377_v54 = vld [vmem:[#allocation2 + $0x354] sm:$0xf0]  ;;  %v2047_v39 = vld [vmem:[#allocation2 + $0xb0] sm:$0xf] }
  0x6b   :  { %1482 = vmatpush.bf16.msra.mxu0 %v1960_v61  ;;  %v2665_v61 = vld [vmem:[#allocation2 + $0x594] sm:$0xf0]  ;;  %v2380_v62 = vor.u32 %v2922_v53, %v2377_v54  ;;  %v2239_v47 = vld [vmem:[#allocation2 + $0x230] sm:$0xf]  ;;  %v2048_v54 = vor.u32 %v2840_v43, %v2047_v39  ;;  %v2876_v43 = vld [vmem:[#allocation2 + $0x1d8] sm:$0xf0] }
  0x6c   :  { %1495 = vmatpush.bf16.msra.mxu1 %v2056_v1  ;;  %v2919_v1 = vld [vmem:[#allocation2 + $0x334] sm:$0xf]  ;;  %v2668_v4 = vor.u32 %v2994_v60, %v2665_v61  ;;  %v2861_v61 = vld [vmem:[#allocation2 + $0x160] sm:$0xf0]  ;;  %v2191_v39 = vld [vmem:[#allocation2 + $0x1d0] sm:$0xf] }
  0x6d   :  { %1508 = vmatpush.bf16.msra.mxu2 %v2152_v2  ;;  %v2365_v2 = vld [vmem:[#allocation2 + $0x33c] sm:$0xf0] }
  0x6e   :  { %1521 = vmatpush.bf16.msra.mxu3 %v2248_v5  ;;  %1483 = vmatmul.bf16.vlgmr.msra.gmra.mxu0 %v3138_v34  ;;  %v2461_v5 = vld [vmem:[#allocation2 + $0x3fc] sm:$0xf0]  ;;  %v2368_v10 = vor.u32 %v2919_v1, %v2365_v2  ;;  %v2909_v1 = vld [vmem:[#allocation2 + $0x2e0] sm:$0xf0]  ;;  %v2036_v2 = vor.u32 %v2837_v58, %v2035_v57 }
  0x6f   :  { %1527 = vmatpush.bf16.msrb.mxu0 %v2428_v6  ;;  %1496 = vmatmul.bf16.vlgmr.msra.gmra.mxu1 %v3142_v42  ;;  %v2967_v6 = vld [vmem:[#allocation2 + $0x4b4] sm:$0xf]  ;;  %v2464_v11 = vor.u32 %v2943_v3, %v2461_v5  ;;  %v2132_v3 = vor.u32 %v2861_v61, %v2131_v59  ;;  %v2023_v5 = vld [vmem:[#allocation2 + $0x80] sm:$0xf]  ;;  %v2897_v57 = vld [vmem:[#allocation2 + $0x280] sm:$0xf0] }
  0x70   :  { %1540 = vmatpush.bf16.msrb.mxu1 %v2524_v7  ;;  %1509 = vmatmul.bf16.vlgmr.msra.gmra.mxu2 %v3136_v33  ;;  %v2557_v7 = vld [vmem:[#allocation2 + $0x4bc] sm:$0xf0] }
  0x71   :  { %1553 = vmatpush.bf16.msrb.mxu2 %v2620_v8  ;;  %1522 = vmatmul.bf16.vlgmr.msra.gmra.mxu3 %v3140_v41  ;;  %v2991_v8 = vld [vmem:[#allocation2 + $0x574] sm:$0xf]  ;;  %v1975_v61 = vld [vmem:[#allocation2 + $0x20] sm:$0xf] }
  0x72   :  { %1566 = vmatpush.bf16.msrb.mxu3 %v2716_v12  ;;  %v2560_v12 = vor.u32 %v2967_v6, %v2557_v7  ;;  %v2656_v16 = vor.u32 %v2991_v8, %v2653_v9  ;;  %v2834_v6 = vld [vmem:[#allocation2 + $0x88] sm:$0xf0]  ;;  %v2119_v7 = vld [vmem:[#allocation2 + $0x140] sm:$0xf] }
  0x73   :  { %1528 = vmatpush.bf16.msrb.mxu0 %v2416_v18  ;;  %v2964_v18 = vld [vmem:[#allocation2 + $0x49c] sm:$0xf]  ;;  %v2858_v9 = vld [vmem:[#allocation2 + $0x148] sm:$0xf0]  ;;  %v2024_v14 = vor.u32 %v2834_v6, %v2023_v5 }
  0x74   :  { %1541 = vmatpush.bf16.msrb.mxu1 %v2512_v19  ;;  %v2545_v19 = vld [vmem:[#allocation2 + $0x4a4] sm:$0xf0]  ;;  %v2120_v15 = vor.u32 %v2858_v9, %v2119_v7  ;;  %v2894_v5 = vld [vmem:[#allocation2 + $0x268] sm:$0xf0] }
  0x75   :  { %1554 = vmatpush.bf16.msrb.mxu2 %v2608_v20  ;;  %v2988_v20 = vld [vmem:[#allocation2 + $0x55c] sm:$0xf]  ;;  %v2548_v26 = vor.u32 %v2964_v18, %v2545_v19  ;;  %v2831_v18 = vld [vmem:[#allocation2 + $0x70] sm:$0xf0]  ;;  %v2107_v19 = vld [vmem:[#allocation2 + $0x128] sm:$0xf] }
  0x76   :  { %1567 = vmatpush.bf16.msrb.mxu3 %v2704_v24  ;;  %v2341_v24 = vld [vmem:[#allocation2 + $0x30c] sm:$0xf0]  ;;  %v1963_v7 = vld [vmem:[#allocation2 + $0x8] sm:$0xf] }
  0x77   :  { %1529 = vmatpush.bf16.msrb.mxu0 %v2404_v30  ;;  %v2644_v30 = vor.u32 %v2988_v20, %v2641_v21  ;;  %v2344_v45 = vor.u32 %v2913_v23, %v2341_v24  ;;  %v2855_v21 = vld [vmem:[#allocation2 + $0x130] sm:$0xf0]  ;;  %v2299_v24 = vld [vmem:[#allocation2 + $0x2a8] sm:$0xf] }
  0x78   :  { %1542 = vmatpush.bf16.msrb.mxu1 %v2500_v31  ;;  %v2533_v31 = vld [vmem:[#allocation2 + $0x48c] sm:$0xf0]  ;;  %v2879_v23 = vld [vmem:[#allocation2 + $0x1f0] sm:$0xf0]  ;;  %v2108_v27 = vor.u32 %v2855_v21, %v2107_v19  ;;  %v2936_v19 = vld [vmem:[#allocation2 + $0x3b8] sm:$0xf0] }
  0x79   :  { %1555 = vmatpush.bf16.msrb.mxu2 %v2596_v35  ;;  %v2985_v35 = vld [vmem:[#allocation2 + $0x544] sm:$0xf] }
  0x7a   :  { %1568 = vmatpush.bf16.msrb.mxu3 %v2692_v44  ;;  %v2143_v44 = vld [vmem:[#allocation2 + $0x170] sm:$0xf]  ;;  %v2632_v53 = vor.u32 %v2985_v35, %v2629_v36  ;;  %v2852_v36 = vld [vmem:[#allocation2 + $0x118] sm:$0xf0] }
  0x7b   :  { %1530 = vmatpush.bf16.msrb.mxu0 %v2392_v50  ;;  %v2536_v50 = vor.u32 %v2961_v29, %v2533_v31  ;;  %v2144_v55 = vor.u32 %v2864_v46, %v2143_v44  ;;  %v1999_v29 = vld [vmem:[#allocation2 + $0x50] sm:$0xf] }
  0x7c   :  { %1543 = vmatpush.bf16.msrb.mxu1 %v2488_v51  ;;  %v2335_v51 = vld [vmem:[#allocation2 + $0x2f0] sm:$0xf] }
  0x7d   :  { %1556 = vmatpush.bf16.msrb.mxu2 %v2584_v52  ;;  %v2912_v52 = vld [vmem:[#allocation2 + $0x2f8] sm:$0xf0]  ;;  %v2095_v31 = vld [vmem:[#allocation2 + $0x110] sm:$0xf] }
  0x7e   :  { %1569 = vmatpush.bf16.msrb.mxu3 %v2680_v56  ;;  %v2240_v56 = vor.u32 %v2888_v48, %v2239_v47  ;;  %v2336_v60 = vor.u32 %v2912_v52, %v2335_v51  ;;  %v2287_v44 = vld [vmem:[#allocation2 + $0x290] sm:$0xf]  ;;  %v2096_v47 = vor.u32 %v2852_v36, %v2095_v31  ;;  %v2192_v48 = vor.u32 %v2876_v43, %v2191_v39  ;;  %v2083_v51 = vld [vmem:[#allocation2 + $0xf8] sm:$0xf]  ;;  %v2933_v39 = vld [vmem:[#allocation2 + $0x3a0] sm:$0xf0] }
  0x7f   :  { %1531 = vmatpush.bf16.msrb.mxu0 %v2380_v62  ;;  %v2227_v62 = vld [vmem:[#allocation2 + $0x218] sm:$0xf] }
  0x80   :  { %1544 = vmatpush.bf16.msrb.mxu1 %v2476_v63  ;;  %v2885_v63 = vld [vmem:[#allocation2 + $0x220] sm:$0xf0]  ;;  %v2419_v36 = vld [vmem:[#allocation2 + $0x398] sm:$0xf] }
  0x81   :  { %1557 = vmatpush.bf16.msrb.mxu2 %v2572_v0  ;;  %v2323_v0 = vld [vmem:[#allocation2 + $0x2d8] sm:$0xf] }
  0x82   :  { %1570 = vmatpush.bf16.msrb.mxu3 %v2668_v4  ;;  %v2228_v4 = vor.u32 %v2885_v63, %v2227_v62  ;;  %v2324_v8 = vor.u32 %v2909_v1, %v2323_v0  ;;  %v2822_v62 = vld [vmem:[#allocation2 + $0x28] sm:$0xf0]  ;;  %v2071_v63 = vld [vmem:[#allocation2 + $0xe0] sm:$0xf]  ;;  %v2515_v43 = vld [vmem:[#allocation2 + $0x458] sm:$0xf] }
  0x83   :  { %1532 = vmatpush.bf16.msrb.mxu0 %v2368_v10  ;;  %v2215_v10 = vld [vmem:[#allocation2 + $0x200] sm:$0xf]  ;;  %v2846_v1 = vld [vmem:[#allocation2 + $0xe8] sm:$0xf0]  ;;  %v1976_v6 = vor.u32 %v2822_v62, %v1975_v61 }
  0x84   :  { %1545 = vmatpush.bf16.msrb.mxu1 %v2464_v11  ;;  %v2882_v11 = vld [vmem:[#allocation2 + $0x208] sm:$0xf0]  ;;  %v2072_v9 = vor.u32 %v2846_v1, %v2071_v63  ;;  %v2395_v1 = vld [vmem:[#allocation2 + $0x368] sm:$0xf] }
  0x85   :  { %1558 = vmatpush.bf16.msrb.mxu2 %v2560_v12  ;;  %v2311_v12 = vld [vmem:[#allocation2 + $0x2c0] sm:$0xf]  ;;  %v3002_v61 = vld [vmem:[#allocation2 + $0x5c8] sm:$0xf0] }
  0x86   :  { %1571 = vmatpush.bf16.msrb.mxu3 %v2656_v16  ;;  %v2216_v16 = vor.u32 %v2882_v11, %v2215_v10  ;;  %v2312_v20 = vor.u32 %v2906_v13, %v2311_v12  ;;  %v2059_v11 = vld [vmem:[#allocation2 + $0xc8] sm:$0xf]  ;;  %v2843_v12 = vld [vmem:[#allocation2 + $0xd0] sm:$0xf0] }
  0x87   :  { %1533 = vmatpush.bf16.msrb.mxu0 %v2356_v22  ;;  %v2203_v22 = vld [vmem:[#allocation2 + $0x1e8] sm:$0xf] }
  0x88   :  { %1546 = vmatpush.bf16.msrb.mxu1 %v2452_v25  ;;  %v2903_v25 = vld [vmem:[#allocation2 + $0x2b0] sm:$0xf0]  ;;  %v2204_v28 = vor.u32 %v2879_v23, %v2203_v22  ;;  %v2155_v13 = vld [vmem:[#allocation2 + $0x188] sm:$0xf]  ;;  %v2960_v22 = vld [vmem:[#allocation2 + $0x478] sm:$0xf0] }
  0x89   :  { %1559 = vmatpush.bf16.msrb.mxu2 %v2548_v26  ;;  %v2012_v26 = vor.u32 %v2831_v18, %v2011_v17  ;;  %v2300_v35 = vor.u32 %v2903_v25, %v2299_v24  ;;  %v2891_v17 = vld [vmem:[#allocation2 + $0x250] sm:$0xf0]  ;;  %v2431_v18 = vld [vmem:[#allocation2 + $0x3b0] sm:$0xf]  ;;  %v2984_v24 = vld [vmem:[#allocation2 + $0x538] sm:$0xf0]  ;;  %v2060_v25 = vor.u32 %v2843_v12, %v2059_v11 }
  0x8a   :  { %1572 = vmatpush.bf16.msrb.mxu3 %v2644_v30  ;;  %v2828_v30 = vld [vmem:[#allocation2 + $0x58] sm:$0xf0]  ;;  %v2623_v23 = vld [vmem:[#allocation2 + $0x530] sm:$0xf] }
  0x8b   :  { %1534 = vmatpush.bf16.msrb.mxu0 %v2344_v45  ;;  %v2900_v45 = vld [vmem:[#allocation2 + $0x298] sm:$0xf0]  ;;  %v2000_v46 = vor.u32 %v2828_v30, %v1999_v29  ;;  %v2432_v30 = vor.u32 %v2936_v19, %v2431_v18  ;;  %v2479_v11 = vld [vmem:[#allocation2 + $0x410] sm:$0xf]  ;;  %v2371_v19 = vld [vmem:[#allocation2 + $0x338] sm:$0xf] }
  0x8c   :  { %1547 = vmatpush.bf16.msrb.mxu1 %v2440_v49  ;;  %v1987_v49 = vld [vmem:[#allocation2 + $0x38] sm:$0xf]  ;;  %v2288_v52 = vor.u32 %v2900_v45, %v2287_v44  ;;  %v2957_v45 = vld [vmem:[#allocation2 + $0x460] sm:$0xf0] }
  0x8d   :  { %1560 = vmatpush.bf16.msrb.mxu2 %v2536_v50  ;;  %v2825_v50 = vld [vmem:[#allocation2 + $0x40] sm:$0xf0] }
  0x8e   :  { %1573 = vmatpush.bf16.msrb.mxu3 %v2632_v53  ;;  %1535 = vmatmul.bf16.vlgmr.msrb.gmra.mxu0 %v3153_v37  ;;  %v2849_v53 = vld [vmem:[#allocation2 + $0x100] sm:$0xf0]  ;;  %v1988_v58 = vor.u32 %v2825_v50, %v1987_v49  ;;  %v2420_v50 = vor.u32 %v2933_v39, %v2419_v36 }
  0x8f   :  { %1579 = vmatpush.bf16.msra.mxu0 %v2048_v54  ;;  %1548 = vmatmul.bf16.vlgmr.msrb.gmra.mxu1 %v3157_v40  ;;  %v2179_v54 = vld [vmem:[#allocation2 + $0x1b8] sm:$0xf]  ;;  %v2084_v59 = vor.u32 %v2849_v53, %v2083_v51  ;;  %v3005_v49 = vld [vmem:[#allocation2 + $0x5e0] sm:$0xf0]  ;;  %v2516_v51 = vor.u32 %v2957_v45, %v2515_v43  ;;  %v2407_v53 = vld [vmem:[#allocation2 + $0x380] sm:$0xf] }
  0x90   :  { %1592 = vmatpush.bf16.msra.mxu1 %v2144_v55  ;;  %1561 = vmatmul.bf16.vlgmr.msrb.gmra.mxu2 %v3151_v32  ;;  %v2873_v55 = vld [vmem:[#allocation2 + $0x1c0] sm:$0xf0]  ;;  %v2918_v43 = vld [vmem:[#allocation2 + $0x328] sm:$0xf0] }
  0x91   :  { %1605 = vmatpush.bf16.msra.mxu2 %v2240_v56  ;;  %1574 = vmatmul.bf16.vlgmr.msrb.gmra.mxu3 %v3155_v38  ;;  %v2275_v56 = vld [vmem:[#allocation2 + $0x278] sm:$0xf] }
  0x92   :  { %1618 = vmatpush.bf16.msra.mxu3 %v2336_v60  ;;  %v2180_v60 = vor.u32 %v2873_v55, %v2179_v54  ;;  %v2276_v0 = vor.u32 %v2897_v57, %v2275_v56  ;;  %v2930_v54 = vld [vmem:[#allocation2 + $0x388] sm:$0xf0]  ;;  %v2503_v55 = vld [vmem:[#allocation2 + $0x440] sm:$0xf] }
  0x93   :  { %1580 = vmatpush.bf16.msra.mxu0 %v2036_v2  ;;  %v2167_v2 = vld [vmem:[#allocation2 + $0x1a0] sm:$0xf]  ;;  %v2954_v57 = vld [vmem:[#allocation2 + $0x448] sm:$0xf0]  ;;  %v2408_v62 = vor.u32 %v2930_v54, %v2407_v53 }
  0x94   :  { %1593 = vmatpush.bf16.msra.mxu1 %v2132_v3  ;;  %v2870_v3 = vld [vmem:[#allocation2 + $0x1a8] sm:$0xf0]  ;;  %v2504_v63 = vor.u32 %v2954_v57, %v2503_v55  ;;  %v2915_v57 = vld [vmem:[#allocation2 + $0x310] sm:$0xf0] }
  0x95   :  { %1606 = vmatpush.bf16.msra.mxu2 %v2228_v4  ;;  %v2263_v4 = vld [vmem:[#allocation2 + $0x260] sm:$0xf]  ;;  %v2168_v10 = vor.u32 %v2870_v3, %v2167_v2  ;;  %v2927_v2 = vld [vmem:[#allocation2 + $0x370] sm:$0xf0] }
  0x96   :  { %1619 = vmatpush.bf16.msra.mxu3 %v2324_v8  ;;  %v2819_v8 = vld [vmem:[#allocation2 + $0x10] sm:$0xf0] }
  0x97   :  { %1581 = vmatpush.bf16.msra.mxu0 %v2024_v14  ;;  %v2264_v14 = vor.u32 %v2894_v5, %v2263_v4  ;;  %v1964_v21 = vor.u32 %v2819_v8, %v1963_v7  ;;  %v2951_v4 = vld [vmem:[#allocation2 + $0x430] sm:$0xf0]  ;;  %v2587_v5 = vld [vmem:[#allocation2 + $0x4e8] sm:$0xf] }
  0x98   :  { %1594 = vmatpush.bf16.msra.mxu1 %v2120_v15  ;;  %v2867_v15 = vld [vmem:[#allocation2 + $0x190] sm:$0xf0]  ;;  %v2683_v7 = vld [vmem:[#allocation2 + $0x5a8] sm:$0xf] }
  0x99   :  { %1607 = vmatpush.bf16.msra.mxu2 %v2216_v16  ;;  %v2251_v16 = vld [vmem:[#allocation2 + $0x248] sm:$0xf] }
  0x9a   :  { %1620 = vmatpush.bf16.msra.mxu3 %v2312_v20  ;;  %v2527_v20 = vld [vmem:[#allocation2 + $0x470] sm:$0xf]  ;;  %v2252_v29 = vor.u32 %v2891_v17, %v2251_v16  ;;  %v2996_v17 = vld [vmem:[#allocation2 + $0x598] sm:$0xf0] }
  0x9b   :  { %1582 = vmatpush.bf16.msra.mxu0 %v2012_v26  ;;  %v2156_v26 = vor.u32 %v2867_v15, %v2155_v13  ;;  %v2528_v31 = vor.u32 %v2960_v22, %v2527_v20  ;;  %v2948_v13 = vld [vmem:[#allocation2 + $0x418] sm:$0xf0]  ;;  %v2671_v16 = vld [vmem:[#allocation2 + $0x590] sm:$0xf]  ;;  %v2921_v22 = vld [vmem:[#allocation2 + $0x340] sm:$0xf0] }
  0x9c   :  { %1595 = vmatpush.bf16.msra.mxu1 %v2108_v27  ;;  %v2719_v27 = vld [vmem:[#allocation2 + $0x5f0] sm:$0xf]  ;;  %v2972_v15 = vld [vmem:[#allocation2 + $0x4d8] sm:$0xf0]  ;;  %v2480_v20 = vor.u32 %v2948_v13, %v2479_v11 }
  0x9d   :  { %1608 = vmatpush.bf16.msra.mxu2 %v2204_v28  ;;  %v3008_v28 = vld [vmem:[#allocation2 + $0x5f8] sm:$0xf0] }
  0x9e   :  { %1621 = vmatpush.bf16.msra.mxu3 %v2300_v35  ;;  %v2624_v35 = vor.u32 %v2984_v24, %v2623_v23  ;;  %v2720_v44 = vor.u32 %v3008_v28, %v2719_v27  ;;  %v2467_v23 = vld [vmem:[#allocation2 + $0x3f8] sm:$0xf]  ;;  %v2945_v24 = vld [vmem:[#allocation2 + $0x400] sm:$0xf0] }
  0x9f   :  { %1583 = vmatpush.bf16.msra.mxu0 %v2000_v46  ;;  %v2611_v46 = vld [vmem:[#allocation2 + $0x518] sm:$0xf]  ;;  %v2969_v27 = vld [vmem:[#allocation2 + $0x4c0] sm:$0xf0]  ;;  %v2468_v36 = vor.u32 %v2945_v24, %v2467_v23 }
  0xa0   :  { %1596 = vmatpush.bf16.msra.mxu1 %v2096_v47  ;;  %v2981_v47 = vld [vmem:[#allocation2 + $0x520] sm:$0xf0]  ;;  %v3178_v28 = vld [vmem:[%s3195_s2] sm:$0x7] }
  0xa1   :  { %1609 = vmatpush.bf16.msra.mxu2 %v2192_v48  ;;  %v2707_v48 = vld [vmem:[#allocation2 + $0x5d8] sm:$0xf]  ;;  %v341_v45 = vperm.slane %v3178_v28, 0 }
  0xa2   :  { %1622 = vmatpush.bf16.msra.mxu3 %v2288_v52  ;;  %v2612_v52 = vor.u32 %v2981_v47, %v2611_v46  ;;  %v2708_v56 = vor.u32 %v3005_v49, %v2707_v48  ;;  %v2942_v47 = vld [vmem:[#allocation2 + $0x3e8] sm:$0xf0]  ;;  %v2551_v48 = vld [vmem:[#allocation2 + $0x4a0] sm:$0xf] }
  0xa3   :  { %1584 = vmatpush.bf16.msra.mxu0 %v1988_v58  ;;  %v2599_v58 = vld [vmem:[#allocation2 + $0x500] sm:$0xf]  ;;  %v2966_v49 = vld [vmem:[#allocation2 + $0x4a8] sm:$0xf0] }
  0xa4   :  { %1597 = vmatpush.bf16.msra.mxu1 %v2084_v59  ;;  %v2978_v59 = vld [vmem:[#allocation2 + $0x508] sm:$0xf0]  ;;  %v2552_v55 = vor.u32 %v2966_v49, %v2551_v48  ;;  %v3017_v49 = vld [vmem:[#allocation4 + $0x40] sm:$0xff] }
  0xa5   :  { %1610 = vmatpush.bf16.msra.mxu2 %v2180_v60  ;;  %v2695_v60 = vld [vmem:[#allocation2 + $0x5c0] sm:$0xf] }
  0xa6   :  { %1623 = vmatpush.bf16.msra.mxu3 %v2276_v0  ;;  %v2600_v0 = vor.u32 %v2978_v59, %v2599_v58  ;;  %v2696_v3 = vor.u32 %v3002_v61, %v2695_v60  ;;  %v2443_v58 = vld [vmem:[#allocation2 + $0x3c8] sm:$0xf]  ;;  %v2939_v61 = vld [vmem:[#allocation2 + $0x3d0] sm:$0xf0] }
  0xa7   :  { %1585 = vmatpush.bf16.msra.mxu0 %v1976_v6  ;;  %v2975_v6 = vld [vmem:[#allocation2 + $0x4f0] sm:$0xf0] }
  0xa8   :  { %1598 = vmatpush.bf16.msra.mxu1 %v2072_v9  ;;  %v2383_v9 = vld [vmem:[#allocation2 + $0x350] sm:$0xf] }
  0xa9   :  { %1611 = vmatpush.bf16.msra.mxu2 %v2168_v10  ;;  %v2924_v10 = vld [vmem:[#allocation2 + $0x358] sm:$0xf0] }
  0xaa   :  { %1624 = vmatpush.bf16.msra.mxu3 %v2264_v14  ;;  %v2575_v14 = vld [vmem:[#allocation2 + $0x4d0] sm:$0xf]  ;;  %v2384_v18 = vor.u32 %v2924_v10, %v2383_v9 }
  0xab   :  { %1586 = vmatpush.bf16.msra.mxu0 %v1964_v21  ;;  %v2576_v21 = vor.u32 %v2972_v15, %v2575_v14  ;;  %v3015_v15 = vld [vmem:[#allocation4 + $0x30] sm:$0xff] }
  0xac   :  { %1599 = vmatpush.bf16.msra.mxu1 %v2060_v25  ;;  %v2672_v25 = vor.u32 %v2996_v17, %v2671_v16  ;;  %v3024_v16 = vld [vmem:[#allocation4 + $0x78] sm:$0xff] }
  0xad   :  { %1612 = vmatpush.bf16.msra.mxu2 %v2156_v26  ;;  %v2563_v26 = vld [vmem:[#allocation2 + $0x4b8] sm:$0xf] }
  0xae   :  { %1625 = vmatpush.bf16.msra.mxu3 %v2252_v29  ;;  %1587 = vmatmul.bf16.vlgmr.msra.gmra.mxu0 %v3138_v34  ;;  %v2999_v34 = vld [vmem:[#allocation2 + $0x5b0] sm:$0xf0]  ;;  %v2659_v29 = vld [vmem:[#allocation2 + $0x578] sm:$0xf]  ;;  %v2564_v39 = vor.u32 %v2969_v27, %v2563_v26 }
  0xaf   :  { %1631 = vmatpush.bf16.msrb.mxu0 %v2432_v30  ;;  %1600 = vmatmul.bf16.vlgmr.msra.gmra.mxu1 %v3142_v42  ;;  %v2588_v42 = vor.u32 %v2975_v6, %v2587_v5  ;;  %v2684_v12 = vor.u32 %v2999_v34, %v2683_v7  ;;  %v2993_v30 = vld [vmem:[#allocation2 + $0x580] sm:$0xf0]  ;;  %v3016_v34 = vld [vmem:[#allocation4 + $0x38] sm:$0xff]  ;;  %v3011_v27 = vld [vmem:[#allocation4 + $0x10] sm:$0xff] }
  0xb0   :  { %1644 = vmatpush.bf16.msrb.mxu1 %v2528_v31  ;;  %1613 = vmatmul.bf16.vlgmr.msra.gmra.mxu2 %v3136_v33  ;;  %v2491_v33 = vld [vmem:[#allocation2 + $0x428] sm:$0xf]  ;;  %v2372_v31 = vor.u32 %v2921_v22, %v2371_v19  ;;  %v2660_v46 = vor.u32 %v2993_v30, %v2659_v29  ;;  %v3021_v22 = vld [vmem:[#allocation4 + $0x60] sm:$0xff]  ;;  %v3020_v29 = vld [vmem:[#allocation4 + $0x58] sm:$0xff] }
  0xb1   :  { %1657 = vmatpush.bf16.msrb.mxu2 %v2624_v35  ;;  %1626 = vmatmul.bf16.vlgmr.msra.gmra.mxu3 %v3140_v41  ;;  %v2396_v41 = vor.u32 %v2927_v2, %v2395_v1  ;;  %v2492_v8 = vor.u32 %v2951_v4, %v2491_v33  ;;  %v2359_v35 = vld [vmem:[#allocation2 + $0x320] sm:$0xf]  ;;  %v2987_v1 = vld [vmem:[#allocation2 + $0x550] sm:$0xf0]  ;;  %v2444_v4 = vor.u32 %v2939_v61, %v2443_v58  ;;  %v3014_v19 = vld [vmem:[#allocation4 + $0x28] sm:$0xff] }
  0xb2   :  { %1670 = vmatpush.bf16.msrb.mxu3 %v2720_v44  ;;  %v2455_v44 = vld [vmem:[#allocation2 + $0x3e0] sm:$0xf]  ;;  %v1380_v53 = vpop.f32.mrf.mxu0 }
  0xb3   :  { %1632 = vmatpush.bf16.msrb.mxu0 %v2420_v50  ;;  %v2647_v50 = vld [vmem:[#allocation2 + $0x560] sm:$0xf]  ;;  %v2456_v54 = vor.u32 %v2942_v47, %v2455_v44  ;;  %v1381_v59 = vadd.f32 %v1380_v53, %v341_v45  ;;  %v3018_v45 = vld [vmem:[#allocation4 + $0x48] sm:$0xff] }
  0xb4   :  { %1645 = vmatpush.bf16.msrb.mxu1 %v2516_v51  ;;  %v2990_v51 = vld [vmem:[#allocation2 + $0x568] sm:$0xf0]  ;;  %v3009_v44 = vld [vmem:[#allocation4] sm:$0xff] }
  0xb5   :  { %1658 = vmatpush.bf16.msrb.mxu2 %v2612_v52  ;;  %v2360_v52 = vor.u32 %v2918_v43, %v2359_v35  ;;  %v2648_v60 = vor.u32 %v2990_v51, %v2647_v50  ;;  %v3010_v35 = vld [vmem:[#allocation4 + $0x8] sm:$0xff] }
  0xb6   :  { %1671 = vmatpush.bf16.msrb.mxu3 %v2708_v56  ;;  %v2347_v56 = vld [vmem:[#allocation2 + $0x308] sm:$0xf]  ;;  %v1393_v2 = vpop.f32.mrf.mxu1 }
  0xb7   :  { %1633 = vmatpush.bf16.msrb.mxu0 %v2408_v62  ;;  %v2539_v62 = vld [vmem:[#allocation2 + $0x488] sm:$0xf]  ;;  %v2348_v33 = vor.u32 %v2915_v57, %v2347_v56 }
  0xb8   :  { %1646 = vmatpush.bf16.msrb.mxu1 %v2504_v63  ;;  %v2963_v63 = vld [vmem:[#allocation2 + $0x490] sm:$0xf0] }
  0xb9   :  { %1659 = vmatpush.bf16.msrb.mxu2 %v2600_v0  ;;  %v2635_v0 = vld [vmem:[#allocation2 + $0x548] sm:$0xf]  ;;  %v2540_v5 = vor.u32 %v2963_v63, %v2539_v62  ;;  %v1406_v7 = vpop.f32.mrf.mxu2 }
  0xba   :  { %1672 = vmatpush.bf16.msrb.mxu3 %v2696_v3  ;;  %v1394_v3 = vadd.f32 %v1393_v2, %v1381_v59  ;;  %v2636_v6 = vor.u32 %v2987_v1, %v2635_v0  ;;  %v3032_v1 = vld [vmem:[#allocation4 + $0xb8] sm:$0xff] }
  0xbb   :  { %1634 = vmatpush.bf16.msrb.mxu0 %v2396_v41 }
  0xbc   :  { %1647 = vmatpush.bf16.msrb.mxu1 %v2492_v8  ;;  %v1407_v41 = vadd.f32 %v1406_v7, %v1394_v3  ;;  %v1419_v8 = vpop.f32.mrf.mxu3  ;;  %v3031_v3 = vld [vmem:[#allocation4 + $0xb0] sm:$0xff] }
  0xbd   :  { %1660 = vmatpush.bf16.msrb.mxu2 %v2588_v42  ;;  %v1382_v42 = vpop.f32.mrf.mxu0 }
  0xbe   :  { %1673 = vmatpush.bf16.msrb.mxu3 %v2684_v12  ;;  %v1420_v9 = vadd.f32 %v1419_v8, %v1407_v41  ;;  %v1395_v10 = vpop.f32.mrf.mxu1 }
  0xbf   :  { %1635 = vmatpush.bf16.msrb.mxu0 %v2384_v18  ;;  %v3029_v10 = vld [vmem:[#allocation4 + $0xa0] sm:$0xff] }
  0xc0   :  { %1648 = vmatpush.bf16.msrb.mxu1 %v2480_v20  ;;  %v3023_v20 = vld [vmem:[#allocation4 + $0x70] sm:$0xff] }
  0xc1   :  { %1661 = vmatpush.bf16.msrb.mxu2 %v2576_v21  ;;  %v1408_v11 = vpop.f32.mrf.mxu2  ;;  %v3022_v21 = vld [vmem:[#allocation4 + $0x68] sm:$0xff] }
  0xc2   :  { %1674 = vmatpush.bf16.msrb.mxu3 %v2672_v25  ;;  %v3028_v11 = vld [vmem:[#allocation4 + $0x98] sm:$0xff] }
  0xc3   :  { %1636 = vmatpush.bf16.msrb.mxu0 %v2372_v31 }
  0xc4   :  { %1649 = vmatpush.bf16.msrb.mxu1 %v2468_v36  ;;  %v1421_v12 = vpop.f32.mrf.mxu3  ;;  %v3019_v36 = vld [vmem:[#allocation4 + $0x50] sm:$0xff] }
  0xc5   :  { %1662 = vmatpush.bf16.msrb.mxu2 %v2564_v39  ;;  %v3027_v12 = vld [vmem:[#allocation4 + $0x90] sm:$0xff] }
  0xc6   :  { %1675 = vmatpush.bf16.msrb.mxu3 %v2660_v46  ;;  %v342_v46 = vperm.slane %v3178_v28, 1 }
  0xc7   :  { %1637 = vmatpush.bf16.msrb.mxu0 %v2360_v52 }
  0xc8   :  { %1650 = vmatpush.bf16.msrb.mxu1 %v2456_v54 }
  0xc9   :  { %1663 = vmatpush.bf16.msrb.mxu2 %v2552_v55 }
  0xca   :  { %1676 = vmatpush.bf16.msrb.mxu3 %v2648_v60 }
  0xcb   :  { %1638 = vmatpush.bf16.msrb.mxu0 %v2348_v33  ;;  %v1432_v13 = vpop.f32.mrf.mxu0 }
  0xcc   :  { %1651 = vmatpush.bf16.msrb.mxu1 %v2444_v4  ;;  %v1445_v14 = vpop.f32.mrf.mxu1  ;;  %v1433_v53 = vadd.f32 %v1432_v13, %v1420_v9 }
  0xcd   :  { %1664 = vmatpush.bf16.msrb.mxu2 %v2540_v5 }
  0xce   :  { %1677 = vmatpush.bf16.msrb.mxu3 %v2636_v6  ;;  %1639 = vmatmul.bf16.vlgmr.msrb.gmra.mxu0 %v3153_v37  ;;  %v1446_v55 = vadd.f32 %v1445_v14, %v1433_v53 }
  0xcf   :  { %1752 = vmatpush.bf16.msra.mxu0 %v3016_v34  ;;  %1652 = vmatmul.bf16.vlgmr.msrb.gmra.mxu1 %v3157_v40  ;;  %v3013_v40 = vld [vmem:[#allocation4 + $0x20] sm:$0xff]  ;;  %v3030_v34 = vld [vmem:[#allocation4 + $0xa8] sm:$0xff] }
  0xd0   :  { %1665 = vmatmul.bf16.vlgmr.msrb.gmra.mxu2 %v3151_v32  ;;  %1834 = vmatpush.bf16.msra.mxu1 %v3024_v16 }
  0xd1   :  { %1678 = vmatmul.bf16.vlgmr.msrb.gmra.mxu3 %v3155_v38  ;;  %v3012_v38 = vld [vmem:[#allocation4 + $0x18] sm:$0xff]  ;;  %1912 = vmatpush.bf16.msra.mxu2 %v3032_v1 }
  0xd3   :  { %1753 = vmatpush.bf16.msra.mxu0 %v3015_v15  ;;  %v1458_v17 = vpop.f32.mrf.mxu2  ;;  %v1434_v37 = vpop.f32.mrf.mxu0  ;;  %v3026_v15 = vld [vmem:[#allocation4 + $0x88] sm:$0xff] }
  0xd4   :  { %v1471_v18 = vpop.f32.mrf.mxu3  ;;  %1835 = vmatpush.bf16.msra.mxu1 %v3023_v20  ;;  %v1447_v32 = vpop.f32.mrf.mxu1  ;;  %v1459_v59 = vadd.f32 %v1458_v17, %v1446_v55  ;;  %v343_v37 = vperm.slane %v3178_v28, 2 }
  0xd5   :  { %1913 = vmatpush.bf16.msra.mxu2 %v3031_v3 }
  0xd6   :  { %v1472_v62 = vadd.f32 %v1471_v18, %v1459_v59 }
  0xd7   :  { %1754 = vmatpush.bf16.msra.mxu0 %v3014_v19  ;;  %v3025_v19 = vld [vmem:[#allocation4 + $0x80] sm:$0xff] }
  0xd8   :  { %1836 = vmatpush.bf16.msra.mxu1 %v3022_v21  ;;  %v1683_v5 = vmax.f32 %v1472_v62, 0.0 }
  0xd9   :  { %1914 = vmatpush.bf16.msra.mxu2 %v3030_v34 }
  0xdb   :  { %1755 = vmatpush.bf16.msra.mxu0 %v3013_v40  ;;  %v1460_v23 = vpop.f32.mrf.mxu2 }
  0xdc   :  { %v1473_v24 = vpop.f32.mrf.mxu3  ;;  %1837 = vmatpush.bf16.msra.mxu1 %v3021_v22 }
  0xdd   :  { %1915 = vmatpush.bf16.msra.mxu2 %v3029_v10 }
  0xdf   :  { %1756 = vmatpush.bf16.msra.mxu0 %v3012_v38 }
  0xe0   :  { %1838 = vmatpush.bf16.msra.mxu1 %v3020_v29 }
  0xe1   :  { %1916 = vmatpush.bf16.msra.mxu2 %v3028_v11 }
  0xe3   :  { %1757 = vmatpush.bf16.msra.mxu0 %v3011_v27 }
  0xe4   :  { %1839 = vmatpush.bf16.msra.mxu1 %v3019_v36 }
  0xe5   :  { %1917 = vmatpush.bf16.msra.mxu2 %v3027_v12 }
  0xe7   :  { %1758 = vmatpush.bf16.msra.mxu0 %v3010_v35 }
  0xe8   :  { %1840 = vmatpush.bf16.msra.mxu1 %v3018_v45 }
  0xe9   :  { %1918 = vmatpush.bf16.msra.mxu2 %v3026_v15 }
  0xeb   :  { %v1484_v25 = vpop.f32.mrf.mxu0  ;;  %1759 = vmatpush.bf16.msra.mxu0 %v3009_v44 }
  0xec   :  { %v1497_v26 = vpop.f32.mrf.mxu1  ;;  %v1485_v50 = vadd.f32 %v1484_v25, %v342_v46  ;;  %1841 = vmatpush.bf16.msra.mxu1 %v3017_v49 }
  0xed   :  { %1919 = vmatpush.bf16.msra.mxu2 %v3025_v19 }
  0xee   :  { %v1498_v51 = vadd.f32 %v1497_v26, %v1485_v50  ;;  %v1925_v50 = vld [vmem:[%s3197_s4] sm:$0x7] }
  0xef   :  { %v1929_v53 = vperm.slane %v1925_v50, 2 }
  0xf3   :  { %v1510_v30 = vpop.f32.mrf.mxu2  ;;  %v1486_v39 = vpop.f32.mrf.mxu0 }
  0xf4   :  { %v1523_v31 = vpop.f32.mrf.mxu3  ;;  %v1499_v43 = vpop.f32.mrf.mxu1  ;;  %v1511_v52 = vadd.f32 %v1510_v30, %v1498_v51  ;;  %v1928_v51 = vperm.slane %v1925_v50, 1 }
  0xf6   :  { %v1524_v54 = vadd.f32 %v1523_v31, %v1511_v52 }
  0xfb   :  { %v1512_v47 = vpop.f32.mrf.mxu2 }
  0xfc   :  { %v1525_v48 = vpop.f32.mrf.mxu3 }
 0x10b   :  { %v1536_v56 = vpop.f32.mrf.mxu0 }
 0x10c   :  { %v1537_v57 = vadd.f32 %v1536_v56, %v1524_v54  ;;  %v1549_v58 = vpop.f32.mrf.mxu1  ;;  %v1927_v54 = vperm.slane %v1925_v50, 0 }
 0x10e   :  { %v1550_v60 = vadd.f32 %v1549_v58, %v1537_v57 }
 0x113   :  { %v1562_v61 = vpop.f32.mrf.mxu2  ;;  %v1538_v33 = vpop.f32.mrf.mxu0 }
 0x114   :  { %v1563_v63 = vadd.f32 %v1562_v61, %v1550_v60  ;;  %v1575_v0 = vpop.f32.mrf.mxu3  ;;  %v1551_v4 = vpop.f32.mrf.mxu1 }
 0x116   :  { %v1576_v2 = vadd.f32 %v1575_v0, %v1563_v63 }
 0x118   :  { %v1684_v6 = vmax.f32 %v1576_v2, 0.0 }
 0x11a   :  { %v1686_v7 = vpack.c.bf16 %v1684_v6, %v1683_v5 }
 0x11b   :  { %v1564_v41 = vpop.f32.mrf.mxu2 }
 0x11c   :  { %v1783_v8 = vunpack.c.h.b16 %v1686_v7  ;;  %1760 = vmatmul.bf16.vlgmr.msra.gmra.mxu0 %v1686_v7  ;;  %v1577_v42 = vpop.f32.mrf.mxu3 }
 0x11e   :  { %v1784_v9 = vpack.c.b16 %v1783_v8, %v1783_v8 }
 0x120   :  { %1842 = vmatmul.bf16.vlgmr.msra.gmra.mxu1 %v1784_v9 }
 0x12b   :  { %v1588_v13 = vpop.f32.mrf.mxu0 }
 0x12c   :  { %v1601_v14 = vpop.f32.mrf.mxu1  ;;  %v1589_v32 = vadd.f32 %v1588_v13, %v343_v37 }
 0x12e   :  { %v1602_v38 = vadd.f32 %v1601_v14, %v1589_v32 }
 0x133   :  { %v1614_v16 = vpop.f32.mrf.mxu2  ;;  %v1590_v18 = vpop.f32.mrf.mxu0 }
 0x134   :  { %v1627_v17 = vpop.f32.mrf.mxu3  ;;  %v1603_v20 = vpop.f32.mrf.mxu1  ;;  %v1615_v22 = vadd.f32 %v1614_v16, %v1602_v38 }
 0x136   :  { %v1628_v23 = vadd.f32 %v1627_v17, %v1615_v22 }
 0x13b   :  { %v1616_v40 = vpop.f32.mrf.mxu2 }
 0x13c   :  { %v1629_v21 = vpop.f32.mrf.mxu3 }
 0x14b   :  { %v1640_v24 = vpop.f32.mrf.mxu0 }
 0x14c   :  { %v1653_v25 = vpop.f32.mrf.mxu1  ;;  %v1641_v26 = vadd.f32 %v1640_v24, %v1628_v23 }
 0x14e   :  { %v1654_v27 = vadd.f32 %v1653_v25, %v1641_v26 }
 0x153   :  { %v1666_v29 = vpop.f32.mrf.mxu2  ;;  %v1642_v35 = vpop.f32.mrf.mxu0 }
 0x154   :  { %v1667_v30 = vadd.f32 %v1666_v29, %v1654_v27  ;;  %v1679_v31 = vpop.f32.mrf.mxu3  ;;  %v1655_v36 = vpop.f32.mrf.mxu1 }
 0x156   :  { %v1680_v39 = vadd.f32 %v1679_v31, %v1667_v30 }
 0x158   :  { %v1685_v43 = vmax.f32 %v1680_v39, 0.0 }
 0x15a   :  { %v1687_v44 = vpack.c.bf16 %v1685_v43, %v1685_v43 }
 0x15b   :  { %v1668_v45 = vpop.f32.mrf.mxu2 }
 0x15c   :  { %v1681_v28 = vpop.f32.mrf.mxu3  ;;  %1920 = vmatmul.bf16.vlgmr.msra.gmra.mxu2 %v1687_v44 }
 0x199   :  { %v1761_v46 = vpop.f32.mrf.mxu0 }
 0x19a   :  { %v1933_v58 = vadd.f32 %v1927_v54, %v1761_v46 }
 0x19d   :  { %v1843_v47 = vpop.f32.mrf.mxu1 }
 0x19e   :  { %v1934_v52 = vadd.f32 %v1928_v51, %v1843_v47 }
 0x1a0   :  { %v1939_v55 = vrot.slane %v1934_v52, 6 }
 0x1a1   :  { %v1763_v48 = vpop.f32.mrf.mxu0 }
 0x1a2   :  { %v1942_v60 = vsel %vm1941_vm0, %v1933_v58, %v1939_v55 }
 0x1a5   :  { %v1845_v49 = vpop.f32.mrf.mxu1 }
 0x1df   :  { %v1921_v56 = vpop.f32.mrf.mxu2 }
 0x1e0   :  { %v1935_v57 = vadd.f32 %v1929_v53, %v1921_v56 }
 0x1e2   :  { %v1940_v59 = vrot.slane %v1935_v57, 4 }
 0x1e4   :  { %v1944_v61 = vsel %vm1943_vm1, %v1942_v60, %v1940_v59 }
 0x1e5   :  { %1946 = vst [vmem:[%s3198_s5] sm:$0x3f] %v1944_v61 }
 0x1e7   :  { %v1923_v62 = vpop.f32.mrf.mxu2 }
 0x1e8   :  { %1951 = vsyncpa [#allocation3], 1 }
 0x1e9   :  { %1952 = vsyncpa [#allocation5], 1 }

</bundles_post_ra>
